<compile_context>
chip_gen: v7x
topology: tpu7x:2x2x1
jax: 0.10.0
libtpu: 0.0.40
codegen_flags: <defaults>
</compile_context>

<pallas_src>
import functools

import jax
import jax.numpy as jnp
from jax.experimental import pallas as pl
from jax.experimental.pallas import tpu as pltpu

MAX_TILE_B = 1024  # rows per grid step for large batches (VMEM-safe on v5e+)


def _round_up(n, m):
    return ((n + m - 1) // m) * m


def policy_net_kernel(x_ref, w1_ref, b1_ref, w2_ref, b2m_ref, o_ref):
    # x_ref:   (Bt, S)       f32 states (native feature width, S ~ 4)
    # w1_ref:  (S, Hp)       f32 layer-1 weights (hidden padded to 128 lanes)
    # b1_ref:  (1, Hp)       f32 layer-1 bias row
    # w2_ref:  (Hp, Ap)      bf16 layer-2 weights (MXU operand)
    # b2m_ref: (1, Ap)       f32 layer-2 bias row; padded action lanes = -1e30
    # o_ref:   (Bt, Ap)      f32 lane-dense probability slab
    x = x_ref[...]
    w1 = w1_ref[...]

    # Layer 1 on the VPU: K == state_dim is tiny, so an unrolled
    # outer-product accumulation avoids a badly-filled K=4 MXU pass.
    acc = x[:, 0:1] * w1[0:1, :]
    for k in range(1, x.shape[1]):                     # static unroll (S-1 adds)
        acc = acc + x[:, k : k + 1] * w1[k : k + 1, :]
    h = jnp.maximum(acc + b1_ref[...], 0.0)            # (Bt, Hp) f32

    # Layer 2 on the MXU: bf16 inputs, f32 accumulation.
    logits = jnp.dot(
        h.astype(jnp.bfloat16), w2_ref[...], preferred_element_type=jnp.float32
    )
    # Bias + compile-time action mask (padded lanes pre-set to -1e30).
    logits = logits + b2m_ref[...]

    # Numerically stable softmax over actions, exact normalization in f32.
    m = jnp.max(logits, axis=-1, keepdims=True)
    e = jnp.exp(logits - m)
    o_ref[...] = e / jnp.sum(e, axis=-1, keepdims=True)


def pack_params(w1, b1, w2, b2):
    """One-time packing (per weight update, NOT per env step).

    w1: (S, H), b1: (H,), w2: (H, A), b2: (A,)  (x @ W convention).
    Returns:
      w1p: (S, Hp)  f32   layer-1 weights, hidden padded to 128 lanes
      b1p: (1, Hp)  f32   layer-1 bias row
      w2p: (Hp, Ap) bf16  layer-2 weights (MXU operand)
      b2m: (1, Ap)  f32   layer-2 bias row with -1e30 baked into padded lanes
    """
    S, H = w1.shape
    A = w2.shape[1]
    h_pad = _round_up(H, 128)
    a_pad = _round_up(A, 128)

    w1p = jnp.zeros((S, h_pad), jnp.float32).at[:, :H].set(
        jnp.asarray(w1, jnp.float32))
    b1p = jnp.zeros((1, h_pad), jnp.float32).at[0, :H].set(
        jnp.asarray(b1, jnp.float32))
    w2p = jnp.zeros((h_pad, a_pad), jnp.bfloat16).at[:H, :A].set(
        jnp.asarray(w2, jnp.float32).astype(jnp.bfloat16))
    # Bias row doubles as the action-lane mask: padded lanes get -1e30 so the
    # softmax zeroes them without any per-step iota/compare/select.
    b2m = jnp.full((1, a_pad), -1e30, jnp.float32).at[0, :A].set(
        jnp.asarray(b2, jnp.float32))
    return w1p, b1p, w2p, b2m


@functools.partial(jax.jit, static_argnames=("action_dim",))
def policy_net_forward_batched(x, w1p, b1p, w2p, b2m, *, action_dim):
    """x: (B, state_dim) -> probs: (B, action_dim)."""
    B, S = x.shape
    h_pad = w1p.shape[1]
    a_pad = w2p.shape[1]

    # Trace-time tile plan (shapes are static under jit).
    n_steps = 1 if B <= MAX_TILE_B else pl.cdiv(B, MAX_TILE_B)
    tile_b = _round_up(pl.cdiv(B, n_steps), 8)   # <= 1024, multiple of 8
    b_pad = tile_b * n_steps

    xp = x.astype(jnp.float32)
    if b_pad != B:  # only materialize a pad when the tile plan requires it
        xp = jnp.pad(xp, ((0, b_pad - B), (0, 0)))

    cost = pl.CostEstimate(
        flops=2 * b_pad * (S * h_pad + h_pad * a_pad),
        transcendentals=b_pad * a_pad,
        bytes_accessed=(4 * b_pad * (S + a_pad)
                        + 4 * (S * h_pad + h_pad + a_pad)
                        + 2 * h_pad * a_pad),
    )

    out = pl.pallas_call(
        policy_net_kernel,
        out_shape=jax.ShapeDtypeStruct((b_pad, a_pad), jnp.float32),
        grid=(b_pad // tile_b,),
        in_specs=[
            pl.BlockSpec((tile_b, S), lambda i: (i, 0)),     # batch-tiled states
            pl.BlockSpec((S, h_pad), lambda i: (0, 0)),      # resident weights
            pl.BlockSpec((1, h_pad), lambda i: (0, 0)),      # resident bias
            pl.BlockSpec((h_pad, a_pad), lambda i: (0, 0)),  # resident weights
            pl.BlockSpec((1, a_pad), lambda i: (0, 0)),      # resident bias+mask
        ],
        out_specs=pl.BlockSpec((tile_b, a_pad), lambda i: (i, 0)),
        compiler_params=pltpu.CompilerParams(
            dimension_semantics=("parallel",)  # v7x: split batch across 2 TCs
        ),
        cost_estimate=cost,
    )(xp, w1p, b1p, w2p, b2m)

    # TODO(synk): fuse the consumer (sampling / log-prob) to avoid this slice.
    return out[:B, :action_dim]


def policy_net_forward(x, w1p, b1p, w2p, b2m, *, action_dim):
    """Single-state (state_dim,) or batched (B, state_dim) forward."""
    if x.ndim == 1:
        return policy_net_forward_batched(
            x[None, :], w1p, b1p, w2p, b2m, action_dim=action_dim)[0]
    return policy_net_forward_batched(
        x, w1p, b1p, w2p, b2m, action_dim=action_dim)


def init_params(key, state_dim, hidden_dim, action_dim):
    """Mimics torch.nn.Linear default init (U[-1/sqrt(fan_in), 1/sqrt(fan_in)])."""
    k1, k2, k3, k4 = jax.random.split(key, 4)
    lim1 = 1.0 / jnp.sqrt(jnp.float32(state_dim))
    lim2 = 1.0 / jnp.sqrt(jnp.float32(hidden_dim))
    w1 = jax.random.uniform(k1, (state_dim, hidden_dim), jnp.float32, -lim1, lim1)
    b1 = jax.random.uniform(k2, (hidden_dim,), jnp.float32, -lim1, lim1)
    w2 = jax.random.uniform(k3, (hidden_dim, action_dim), jnp.float32, -lim2, lim2)
    b2 = jax.random.uniform(k4, (action_dim,), jnp.float32, -lim2, lim2)
    return w1, b1, w2, b2


if __name__ == "__main__":
    # CartPole-like sizes: state_dim=4, hidden_dim=32, action_dim=2.
    state_dim, hidden_dim, action_dim = 4, 32, 2
    batch = 200  # small rollout batch -> single-grid-step fast path, no padding

    key = jax.random.PRNGKey(0)
    k_x, k_p, k_big = jax.random.split(key, 3)
    xb = jax.random.normal(k_x, (batch, state_dim), jnp.float32)
    w1, b1, w2, b2 = init_params(k_p, state_dim, hidden_dim, action_dim)

    # One-time parameter packing (per weight update, NOT per env step).
    w1p, b1p, w2p, b2m = pack_params(w1, b1, w2, b2)

    def ref_forward(x):
        h = jnp.maximum(x @ w1 + b1, 0.0)
        return jax.nn.softmax(h @ w2 + b2, axis=-1)

    # --- Batched forward (single-step path). ---
    probs = jax.block_until_ready(
        policy_net_forward_batched(xb, w1p, b1p, w2p, b2m, action_dim=action_dim))
    probs_ref = ref_forward(xb)
    assert probs.shape == (batch, action_dim)
    # Layer-2 MXU inputs are bf16 -> compare to the f32 reference at bf16-level
    # tolerance; normalization itself is exact (tight row-sum check below).
    assert jnp.allclose(probs, probs_ref, atol=1e-2, rtol=1e-2)
    assert jnp.allclose(jnp.sum(probs, axis=-1), 1.0, atol=1e-5)

    # --- Single-state path (PyTorch module on a 1-D state: Softmax(dim=0)). ---
    x0 = xb[0]
    p0 = jax.block_until_ready(
        policy_net_forward(x0, w1p, b1p, w2p, b2m, action_dim=action_dim))
    p0_ref = jax.nn.softmax(jnp.maximum(x0 @ w1 + b1, 0.0) @ w2 + b2, axis=0)
    assert p0.shape == (action_dim,)
    assert jnp.allclose(p0, p0_ref, atol=1e-2, rtol=1e-2)

    # --- Larger batch: exercises the multi-step (>=2 "parallel" grid steps)
    #     and batch-padding branch. ---
    big = 1250
    xl = jax.random.normal(k_big, (big, state_dim), jnp.float32)
    probs_big = jax.block_until_ready(
        policy_net_forward_batched(xl, w1p, b1p, w2p, b2m, action_dim=action_dim))
    assert probs_big.shape == (big, action_dim)
    assert jnp.allclose(probs_big, ref_forward(xl), atol=1e-2, rtol=1e-2)
    assert jnp.allclose(jnp.sum(probs_big, axis=-1), 1.0, atol=1e-5)

    print("KERNEL_OK")
</pallas_src>

<mosaic_0001>
module attributes {stable_mosaic.version = 11 : i64} {
  func.func @policy_net_kernel(%arg0: i32, %arg1: memref<200x4xf32, #tpu.memory_space<vmem>>, %arg2: memref<4x128xf32, #tpu.memory_space<vmem>>, %arg3: memref<1x128xf32, #tpu.memory_space<vmem>>, %arg4: memref<128x128xbf16, #tpu.memory_space<vmem>>, %arg5: memref<1x128xf32, #tpu.memory_space<vmem>>, %arg6: memref<200x128xf32, #tpu.memory_space<vmem>>) attributes {dimension_semantics = [#tpu.dimension_semantics<parallel>], iteration_bounds = array<i64: 1>, scalar_prefetch = 0 : i64, scratch_operands = 0 : i64, tpu.core_type = #tpu.core_type<tc>, window_params = [{transform_indices = @transform_0, window_bounds = array<i64: 200, 4>}, {pipeline_mode = #tpu.pipeline_mode<synchronous>, transform_indices = @transform_1, window_bounds = array<i64: 4, 128>}, {pipeline_mode = #tpu.pipeline_mode<synchronous>, transform_indices = @transform_2, window_bounds = array<i64: 1, 128>}, {pipeline_mode = #tpu.pipeline_mode<synchronous>, transform_indices = @transform_3, window_bounds = array<i64: 128, 128>}, {pipeline_mode = #tpu.pipeline_mode<synchronous>, transform_indices = @transform_4, window_bounds = array<i64: 1, 128>}, {transform_indices = @transform_5, window_bounds = array<i64: 200, 128>}]} {
    %c0 = arith.constant 0 : index
    %c0_0 = arith.constant 0 : index
    %0 = vector.load %arg1[%c0, %c0_0] : memref<200x4xf32, #tpu.memory_space<vmem>>, vector<200x4xf32>
    %c0_1 = arith.constant 0 : index
    %c0_2 = arith.constant 0 : index
    %1 = vector.load %arg2[%c0_1, %c0_2] : memref<4x128xf32, #tpu.memory_space<vmem>>, vector<4x128xf32>
    %2 = vector.extract_strided_slice %0 {offsets = [0, 0], sizes = [200, 1], strides = [1, 1]} : vector<200x4xf32> to vector<200x1xf32>
    %3 = vector.extract_strided_slice %1 {offsets = [0, 0], sizes = [1, 128], strides = [1, 1]} : vector<4x128xf32> to vector<1x128xf32>
    %4 = vector.broadcast %2 : vector<200x1xf32> to vector<200x128xf32>
    %5 = vector.broadcast %3 : vector<1x128xf32> to vector<200x128xf32>
    %6 = arith.mulf %4, %5 : vector<200x128xf32>
    %7 = vector.extract_strided_slice %0 {offsets = [0, 1], sizes = [200, 1], strides = [1, 1]} : vector<200x4xf32> to vector<200x1xf32>
    %8 = vector.extract_strided_slice %1 {offsets = [1, 0], sizes = [1, 128], strides = [1, 1]} : vector<4x128xf32> to vector<1x128xf32>
    %9 = vector.broadcast %7 : vector<200x1xf32> to vector<200x128xf32>
    %10 = vector.broadcast %8 : vector<1x128xf32> to vector<200x128xf32>
    %11 = arith.mulf %9, %10 : vector<200x128xf32>
    %12 = arith.addf %6, %11 : vector<200x128xf32>
    %13 = vector.extract_strided_slice %0 {offsets = [0, 2], sizes = [200, 1], strides = [1, 1]} : vector<200x4xf32> to vector<200x1xf32>
    %14 = vector.extract_strided_slice %1 {offsets = [2, 0], sizes = [1, 128], strides = [1, 1]} : vector<4x128xf32> to vector<1x128xf32>
    %15 = vector.broadcast %13 : vector<200x1xf32> to vector<200x128xf32>
    %16 = vector.broadcast %14 : vector<1x128xf32> to vector<200x128xf32>
    %17 = arith.mulf %15, %16 : vector<200x128xf32>
    %18 = arith.addf %12, %17 : vector<200x128xf32>
    %19 = vector.extract_strided_slice %0 {offsets = [0, 3], sizes = [200, 1], strides = [1, 1]} : vector<200x4xf32> to vector<200x1xf32>
    %20 = vector.extract_strided_slice %1 {offsets = [3, 0], sizes = [1, 128], strides = [1, 1]} : vector<4x128xf32> to vector<1x128xf32>
    %21 = vector.broadcast %19 : vector<200x1xf32> to vector<200x128xf32>
    %22 = vector.broadcast %20 : vector<1x128xf32> to vector<200x128xf32>
    %23 = arith.mulf %21, %22 : vector<200x128xf32>
    %24 = arith.addf %18, %23 : vector<200x128xf32>
    %c0_3 = arith.constant 0 : index
    %c0_4 = arith.constant 0 : index
    %25 = vector.load %arg3[%c0_3, %c0_4] : memref<1x128xf32, #tpu.memory_space<vmem>>, vector<1x128xf32>
    %26 = vector.broadcast %25 : vector<1x128xf32> to vector<200x128xf32>
    %27 = arith.addf %24, %26 : vector<200x128xf32>
    %cst = arith.constant 0.000000e+00 : f32
    %28 = vector.broadcast %cst : f32 to vector<200x128xf32>
    %29 = arith.maximumf %27, %28 : vector<200x128xf32>
    %30 = arith.truncf %29 : vector<200x128xf32> to vector<200x128xbf16>
    %c0_5 = arith.constant 0 : index
    %c0_6 = arith.constant 0 : index
    %31 = vector.load %arg4[%c0_5, %c0_6] : memref<128x128xbf16, #tpu.memory_space<vmem>>, vector<128x128xbf16>
    %cst_7 = arith.constant dense<0.000000e+00> : vector<200x128xf32>
    %32 = tpu.matmul %30, %31, %cst_7 {dimension_numbers = #tpu.dot_dimension_numbers<[1], [0], [0], [1], [0, 0, 1, 1], [], []>} : vector<200x128xbf16>, vector<128x128xbf16>, vector<200x128xf32> -> vector<200x128xf32>
    %c0_8 = arith.constant 0 : index
    %c0_9 = arith.constant 0 : index
    %33 = vector.load %arg5[%c0_8, %c0_9] : memref<1x128xf32, #tpu.memory_space<vmem>>, vector<1x128xf32>
    %34 = vector.broadcast %33 : vector<1x128xf32> to vector<200x128xf32>
    %35 = arith.addf %32, %34 : vector<200x128xf32>
    %cst_10 = arith.constant dense<0xFF800000> : vector<200xf32>
    %36 = vector.multi_reduction <maximumf>, %35, %cst_10 [1] : vector<200x128xf32> to vector<200xf32>
    %37 = vector.shape_cast %36 : vector<200xf32> to vector<200x1xf32>
    %38 = vector.broadcast %37 : vector<200x1xf32> to vector<200x128xf32>
    %39 = arith.subf %35, %38 : vector<200x128xf32>
    %40 = math.exp %39 : vector<200x128xf32>
    %cst_11 = arith.constant dense<0.000000e+00> : vector<200xf32>
    %41 = vector.multi_reduction <add>, %40, %cst_11 [1] : vector<200x128xf32> to vector<200xf32>
    %42 = vector.shape_cast %41 : vector<200xf32> to vector<200x1xf32>
    %43 = vector.broadcast %42 : vector<200x1xf32> to vector<200x128xf32>
    %44 = arith.divf %40, %43 : vector<200x128xf32>
    %c0_12 = arith.constant 0 : index
    %c0_13 = arith.constant 0 : index
    %45 = vector.load %arg6[%c0_12, %c0_13] : memref<200x128xf32, #tpu.memory_space<vmem>>, vector<200x128xf32>
    tpu.vector_store %arg6[%c0_12, %c0_13], %44 {strides = array<i32>} : memref<200x128xf32, #tpu.memory_space<vmem>>, vector<200x128xf32>,
    return
  }
  func.func @transform_0(%arg0: i32) -> (i32, i32) {
    %c0_i32 = arith.constant 0 : i32
    %c0_i32_0 = arith.constant 0 : i32
    return %arg0, %c0_i32 : i32, i32
  }
  func.func @transform_1(%arg0: i32) -> (i32, i32) {
    %c0_i32 = arith.constant 0 : i32
    %c0_i32_0 = arith.constant 0 : i32
    %c0_i32_1 = arith.constant 0 : i32
    return %c0_i32, %c0_i32_0 : i32, i32
  }
  func.func @transform_2(%arg0: i32) -> (i32, i32) {
    %c0_i32 = arith.constant 0 : i32
    %c0_i32_0 = arith.constant 0 : i32
    %c0_i32_1 = arith.constant 0 : i32
    return %c0_i32, %c0_i32_0 : i32, i32
  }
  func.func @transform_3(%arg0: i32) -> (i32, i32) {
    %c0_i32 = arith.constant 0 : i32
    %c0_i32_0 = arith.constant 0 : i32
    %c0_i32_1 = arith.constant 0 : i32
    return %c0_i32, %c0_i32_0 : i32, i32
  }
  func.func @transform_4(%arg0: i32) -> (i32, i32) {
    %c0_i32 = arith.constant 0 : i32
    %c0_i32_0 = arith.constant 0 : i32
    %c0_i32_1 = arith.constant 0 : i32
    return %c0_i32, %c0_i32_0 : i32, i32
  }
  func.func @transform_5(%arg0: i32) -> (i32, i32) {
    %c0_i32 = arith.constant 0 : i32
    %c0_i32_0 = arith.constant 0 : i32
    return %arg0, %c0_i32 : i32, i32
  }
}

</mosaic_0001>

<bundles_post_ra>
// kernel: policy_net_forward_batched.1
= control target key start
LH: loop header
LB: loop body
LE: loop exit
PB: predicated region body
PF: predicated region fallthrough
CT: control target
= control target key end

     0   :  { %v2391_v0 = vmov 3   ;;  %v2395_v1 = vmov 1   ;;  %v1469_v6 = vmov 2   ;;  %v2393_v11 = vmov 0   ;;  %s2383_s0 = inlined_call_operand.vmem [shape: f32[200,4], index: 0, kind: input, shape index: {}]   ;;  %s2384_s3 = inlined_call_operand.vmem [shape: bf16[128,128], index: 3, kind: input, shape index: {}]   ;;  %s2385_s1 = inlined_call_operand.vmem [shape: f32[4,128], index: 1, kind: input, shape index: {}]   ;;  %s2386_s2 = inlined_call_operand.vmem [shape: f32[1,128], index: 2, kind: input, shape index: {}]   ;;  %s2387_s4 = inlined_call_operand.vmem [shape: f32[1,128], index: 4, kind: input, shape index: {}]   ;;  %s2388_s5 = inlined_call_operand.vmem [shape: f32[200,128], index: 5, kind: output, shape index: {}]  }
   0x1   :  { %1318 = vset.pattern.permute.xlu0 %v2391_v0  ;;  %1315 = vset.pattern.permute.xlu1 %v2395_v1  ;;  %v22_v2 = vld [vmem:[%s2383_s0 + $0x8] sm:$0xff]  ;;  %v1511_v3 = vld [vmem:[%s2383_s0] sm:$0xff]  ;;  %v24_v4 = vld [vmem:[%s2383_s0 + $0x18] sm:$0xff]  ;;  %v2389_v24 = vmov 0.0   ;;  %vm1472_vm0 = vmmov 0  }
   0x2   :  { %514 = vperm.xlu0 %1318, %v22_v2   ;;  %202 = vperm.xlu1 %1315, %v1511_v3   ;;  %v1520_v5 = vld [vmem:[%s2383_s0 + $0x28] sm:$0xff]  ;;  %v1527_v7 = vld [vmem:[%s2383_s0 + $0x38] sm:$0xff]  ;;  %v1541_v9 = vld [vmem:[%s2383_s0 + $0x10] sm:$0xff] }
   0x3   :  { %v1534_v8 = vld [vmem:[%s2383_s0 + $0x48] sm:$0xff]  ;;  %v1546_v10 = vld [vmem:[%s2383_s0 + $0x58] sm:$0xff]  ;;  %v35_v13 = vld [vmem:[%s2383_s0 + $0x70] sm:$0xff]  ;;  %1225 = vmatprep.subr.bf16.mxu0 %v2389_v24  ;;  %1293 = vmatprep.subr.bf16.mxu1 %v2389_v24 }
   0x4   :  { %v1557_v12 = vld [vmem:[%s2383_s0 + $0x78] sm:$0xff]  ;;  %v1567_v14 = vld [vmem:[%s2383_s0 + $0x20] sm:$0xff]  ;;  %v1574_v15 = vld [vmem:[%s2383_s0 + $0x30] sm:$0xff]  ;;  %1241 = vmatprep.mubr.msk.bf16.mxu0 %vm1472_vm0, %v2389_v24  ;;  %1269 = vmatprep.mubr.msk.bf16.mxu1 %vm1472_vm0, %v2389_v24 }
   0x5   :  { %v1581_v16 = vld [vmem:[%s2383_s0 + $0x40] sm:$0xff]  ;;  %v1588_v17 = vld [vmem:[%s2383_s0 + $0x50] sm:$0xff]  ;;  %v1630_v22 = vld [vmem:[%s2383_s0 + $0x88] sm:$0xff] }
   0x6   :  { %522 = vperm.xlu0 %1318, %v24_v4   ;;  %206 = vperm.xlu1 %1315, %v22_v2   ;;  %v1594_v18 = vld [vmem:[%s2383_s0 + $0x60] sm:$0xff]  ;;  %v1615_v20 = vld [vmem:[%s2383_s0 + $0x90] sm:$0xff]  ;;  %v1360_v25 = vld [vmem:[%s2384_s3 + $0x8] sm:$0xff]  }
   0x7   :  { %v1605_v19 = vld [vmem:[%s2383_s0 + $0x80] sm:$0xff]  ;;  %v1361_v26 = vld [vmem:[%s2384_s3 + $0x10] sm:$0xff]   ;;  %v1362_v28 = vld [vmem:[%s2384_s3 + $0x18] sm:$0xff]  }
   0x8   :  { %v1623_v21 = vld [vmem:[%s2383_s0 + $0xa0] sm:$0xff]  ;;  %v1655_v27 = vld [vmem:[%s2383_s0 + $0xb0] sm:$0xff]  ;;  %v1667_v29 = vld [vmem:[%s2383_s0 + $0x68] sm:$0xff] }
   0x9   :  { %v1359_v23 = vld [vmem:[%s2384_s3] sm:$0xff]   ;;  %v1364_v31 = vld [vmem:[%s2384_s3 + $0x28] sm:$0xff]   ;;  %v1365_v32 = vld [vmem:[%s2384_s3 + $0x30] sm:$0xff]  }
   0xa   :  { %530 = vperm.xlu0 %1318, %v1520_v5   ;;  %1316 = vset.pattern.permute.xlu1 %v1469_v6  ;;  %v1363_v30 = vld [vmem:[%s2384_s3 + $0x20] sm:$0xff]   ;;  %v1366_v33 = vld [vmem:[%s2384_s3 + $0x38] sm:$0xff]   ;;  %v1725_v37 = vld [vmem:[%s2383_s0 + $0xa8] sm:$0xff] }
   0xb   :  { %360 = vperm.xlu1 %1316, %v22_v2   ;;  %1226 = vmatpush3.bf16.msra.mxu0 %v1359_v23  ;;  %v40_v34 = vld [vmem:[%s2383_s0 + $0x98] sm:$0xff] }
   0xc   :  { %1227 = vmatprep.subr.bf16.mxu0 %v2389_v24  ;;  %1301 = vmatpush3.bf16.msra.mxu1 %v1359_v23  ;;  %v1742_v42 = vld [vmem:[%s2383_s0 + $0xb8] sm:$0xff] }
   0xd   :  { %1294 = vmatprep.subr.bf16.mxu1 %v2389_v24 }
   0xe   :  { %538 = vperm.xlu0 %1318, %v1527_v7  }
   0xf   :  { %1317 = vset.pattern.permute.xlu1 %v2391_v0  ;;  %1228 = vmatpush3.bf16.msra.mxu0 %v1360_v25 }
  0x10   :  { %510 = vperm.xlu1 %1317, %v1511_v3   ;;  %1229 = vmatprep.subr.bf16.mxu0 %v2389_v24 }
  0x11   :  { %1302 = vmatpush3.bf16.msra.mxu1 %v1360_v25 }
  0x12   :  { %546 = vperm.xlu0 %1318, %v1534_v8   ;;  %1295 = vmatprep.subr.bf16.mxu1 %v2389_v24 }
  0x13   :  { %1230 = vmatpush3.bf16.msra.mxu0 %v1361_v26 }
  0x14   :  { %1319 = vset.pattern.permute.xlu1 %v2393_v11  ;;  %1231 = vmatprep.subr.bf16.mxu0 %v2389_v24 }
  0x15   :  { %59 = vperm.xlu1 %1319, %v1541_v9   ;;  %1303 = vmatpush3.bf16.msra.mxu1 %v1361_v26 }
  0x16   :  { %554 = vperm.xlu0 %1318, %v1546_v10   ;;  %1296 = vmatprep.subr.bf16.mxu1 %v2389_v24 }
  0x17   :  { %1232 = vmatpush3.bf16.msra.mxu0 %v1362_v28 }
  0x18   :  { %1233 = vmatprep.subr.bf16.mxu0 %v2389_v24 }
  0x19   :  { %64 = vperm.xlu1 %1319, %v24_v4   ;;  %1304 = vmatpush3.bf16.msra.mxu1 %v1362_v28 }
  0x1a   :  { %1349 = vset.pattern.permute.xlu0 %v2393_v11  ;;  %1297 = vmatprep.subr.bf16.mxu1 %v2389_v24 }
  0x1b   :  { %49 = vperm.xlu0 %1349, %v1511_v3   ;;  %1234 = vmatpush3.bf16.msra.mxu0 %v1363_v30 }
  0x1c   :  { %1235 = vmatprep.subr.bf16.mxu0 %v2389_v24 }
  0x1d   :  { %1320 = vset.pattern.permute.xlu1 %v2395_v1  ;;  %1305 = vmatpush3.bf16.msra.mxu1 %v1363_v30 }
  0x1e   :  { %214 = vperm.xlu1 %1320, %v24_v4   ;;  %1298 = vmatprep.subr.bf16.mxu1 %v2389_v24 }
  0x1f   :  { %54 = vperm.xlu0 %1349, %v22_v2   ;;  %1236 = vmatpush3.bf16.msra.mxu0 %v1364_v31 }
  0x20   :  { %1237 = vmatprep.subr.bf16.mxu0 %v2389_v24 }
  0x21   :  { %1306 = vmatpush3.bf16.msra.mxu1 %v1364_v31 }
  0x22   :  { %1321 = vset.pattern.permute.xlu1 %v2393_v11  ;;  %1299 = vmatprep.subr.bf16.mxu1 %v2389_v24 }
  0x23   :  { %124 = vperm.xlu0 %1349, %v1557_v12   ;;  %119 = vperm.xlu1 %1321, %v35_v13  }
  0x24   :  { %1238 = vmatpush3.bf16.msra.mxu0 %v1365_v32 }
  0x25   :  { %1239 = vmatprep.subr.bf16.mxu0 %v2389_v24  ;;  %1307 = vmatpush3.bf16.msra.mxu1 %v1365_v32 }
  0x26   :  { %1300 = vmatprep.subr.bf16.mxu1 %v2389_v24 }
  0x27   :  { %69 = vperm.xlu0 %1349, %v1567_v14   ;;  %1322 = vset.pattern.permute.xlu1 %v2395_v1 }
  0x28   :  { %258 = vperm.xlu1 %1322, %v35_v13   ;;  %1240 = vmatpush3.bf16.msra.mxu0 %v1366_v33 }
  0x29   :  { %1308 = vmatpush3.bf16.msra.mxu1 %v1366_v33 }
  0x2b   :  { %79 = vperm.xlu0 %1349, %v1574_v15  }
  0x2c   :  { %262 = vperm.xlu1 %1322, %v1557_v12  }
  0x2f   :  { %89 = vperm.xlu0 %1349, %v1581_v16  }
  0x30   :  { %1323 = vset.pattern.permute.xlu1 %v1469_v6 }
  0x31   :  { %368 = vperm.xlu1 %1323, %v24_v4  }
  0x33   :  { %99 = vperm.xlu0 %1349, %v1588_v17  }
  0x35   :  { %412 = vperm.xlu1 %1323, %v35_v13  }
  0x37   :  { %109 = vperm.xlu0 %1349, %v1594_v18  }
  0x39   :  { %1324 = vset.pattern.permute.xlu1 %v2391_v0 }
  0x3a   :  { %518 = vperm.xlu1 %1324, %v1541_v9  }
  0x3b   :  { %1350 = vset.pattern.permute.xlu0 %v2395_v1 }
  0x3c   :  { %210 = vperm.xlu0 %1350, %v1541_v9  }
  0x3e   :  { %566 = vperm.xlu1 %1324, %v35_v13  }
  0x40   :  { %222 = vperm.xlu0 %1350, %v1520_v5  }
  0x42   :  { %570 = vperm.xlu1 %1324, %v1557_v12  }
  0x44   :  { %266 = vperm.xlu0 %1350, %v1605_v19  }
  0x46   :  { %1325 = vset.pattern.permute.xlu1 %v2393_v11 }
  0x47   :  { %74 = vperm.xlu1 %1325, %v1520_v5  }
  0x48   :  { %230 = vperm.xlu0 %1350, %v1527_v7  }
  0x4b   :  { %1326 = vset.pattern.permute.xlu1 %v2395_v1 }
  0x4c   :  { %274 = vperm.xlu0 %1350, %v1615_v20   ;;  %218 = vperm.xlu1 %1326, %v1567_v14  }
  0x50   :  { %238 = vperm.xlu0 %1350, %v1534_v8   ;;  %1327 = vset.pattern.permute.xlu1 %v2393_v11 }
  0x51   :  { %129 = vperm.xlu1 %1327, %v1605_v19  }
  0x54   :  { %282 = vperm.xlu0 %1350, %v1623_v21  }
  0x55   :  { %134 = vperm.xlu1 %1327, %v1630_v22  }
  0x58   :  { %246 = vperm.xlu0 %1350, %v1546_v10  }
  0x59   :  { %1328 = vset.pattern.permute.xlu1 %v2395_v1 }
  0x5a   :  { %270 = vperm.xlu1 %1328, %v1630_v22  }
  0x5c   :  { %290 = vperm.xlu0 %1350, %v1655_v27  }
  0x5e   :  { %1329 = vset.pattern.permute.xlu1 %v1469_v6 }
  0x5f   :  { %376 = vperm.xlu1 %1329, %v1520_v5  }
  0x60   :  { %254 = vperm.xlu0 %1350, %v1667_v29  }
  0x63   :  { %420 = vperm.xlu1 %1329, %v1605_v19  }
  0x64   :  { %1353 = vset.pattern.permute.xlu0 %v1469_v6 }
  0x65   :  { %356 = vperm.xlu0 %1353, %v1511_v3  }
  0x67   :  { %1330 = vset.pattern.permute.xlu1 %v2391_v0 }
  0x68   :  { %526 = vperm.xlu1 %1330, %v1567_v14  }
  0x69   :  { %364 = vperm.xlu0 %1353, %v1541_v9  }
  0x6c   :  { %574 = vperm.xlu1 %1330, %v1605_v19  }
  0x6d   :  { %416 = vperm.xlu0 %1353, %v1557_v12  }
  0x70   :  { %578 = vperm.xlu1 %1330, %v1630_v22  }
  0x71   :  { %372 = vperm.xlu0 %1353, %v1567_v14  }
  0x74   :  { %1331 = vset.pattern.permute.xlu1 %v2393_v11 }
  0x75   :  { %424 = vperm.xlu0 %1353, %v1630_v22   ;;  %84 = vperm.xlu1 %1331, %v1527_v7  }
  0x79   :  { %1332 = vset.pattern.permute.xlu1 %v2395_v1  ;;  %380 = vperm.xlu0 %1353, %v1574_v15  }
  0x7a   :  { %226 = vperm.xlu1 %1332, %v1574_v15  }
  0x7d   :  { %432 = vperm.xlu0 %1353, %v40_v34  }
  0x7e   :  { %1333 = vset.pattern.permute.xlu1 %v2393_v11 }
  0x7f   :  { %139 = vperm.xlu1 %1333, %v1615_v20  }
  0x81   :  { %v1717_v35 = vpop.permute.xlu1 %202  ;;  %v1719_v36 = vpop.permute.xlu0 %514  ;;  %388 = vperm.xlu0 %1353, %v1581_v16  }
  0x83   :  { %144 = vperm.xlu1 %1333, %v40_v34  }
  0x85   :  { %v1727_v38 = vpop.permute.xlu1 %206  ;;  %v1729_v39 = vpop.permute.xlu0 %522  ;;  %440 = vperm.xlu0 %1353, %v1725_v37  }
  0x87   :  { %1334 = vset.pattern.permute.xlu1 %v2395_v1 }
  0x88   :  { %278 = vperm.xlu1 %1334, %v40_v34  }
  0x89   :  { %v1733_v40 = vpop.permute.xlu0 %530  ;;  %396 = vperm.xlu0 %1353, %v1588_v17  }
  0x8a   :  { %v1736_v41 = vpop.permute.xlu1 %360 }
  0x8c   :  { %1335 = vset.pattern.permute.xlu1 %v1469_v6 }
  0x8d   :  { %384 = vperm.xlu1 %1335, %v1527_v7   ;;  %v1745_v43 = vpop.permute.xlu0 %538  ;;  %448 = vperm.xlu0 %1353, %v1742_v42  }
  0x8f   :  { %v1748_v44 = vpop.permute.xlu1 %510 }
  0x91   :  { %428 = vperm.xlu1 %1335, %v1615_v20   ;;  %v1751_v45 = vpop.permute.xlu0 %546  ;;  %404 = vperm.xlu0 %1353, %v1594_v18  }
  0x94   :  { %v1754_v46 = vpop.permute.xlu1 %59 }
  0x95   :  { %1336 = vset.pattern.permute.xlu1 %v2391_v0  ;;  %v1757_v47 = vpop.permute.xlu0 %554  ;;  %1357 = vset.pattern.permute.xlu0 %v2391_v0 }
  0x96   :  { %534 = vperm.xlu1 %1336, %v1574_v15   ;;  %558 = vperm.xlu0 %1357, %v1594_v18  }
  0x98   :  { %v1762_v48 = vpop.permute.xlu1 %64 }
  0x9a   :  { %v1764_v49 = vpop.permute.xlu0 %49  ;;  %582 = vperm.xlu1 %1336, %v1615_v20  }
  0x9d   :  { %v1767_v50 = vpop.permute.xlu1 %214 }
  0x9e   :  { %v55_v51 = vpop.permute.xlu0 %54  ;;  %586 = vperm.xlu1 %1336, %v40_v34  }
  0xa2   :  { %1337 = vset.pattern.permute.xlu1 %v2393_v11  ;;  %v1770_v52 = vpop.permute.xlu1 %119  ;;  %v1772_v53 = vpop.permute.xlu0 %124 }
  0xa3   :  { %94 = vperm.xlu1 %1337, %v1534_v8  }
  0xa6   :  { %v1775_v54 = vpop.permute.xlu0 %69 }
  0xa7   :  { %1338 = vset.pattern.permute.xlu1 %v2395_v1  ;;  %v1778_v55 = vpop.permute.xlu1 %258 }
  0xa8   :  { %234 = vperm.xlu1 %1338, %v1581_v16  }
  0xaa   :  { %v1781_v56 = vpop.permute.xlu0 %79 }
  0xab   :  { %v1783_v57 = vpop.permute.xlu1 %262 }
  0xac   :  { %1339 = vset.pattern.permute.xlu1 %v2393_v11 }
  0xad   :  { %149 = vperm.xlu1 %1339, %v1623_v21  }
  0xae   :  { %v1787_v58 = vpop.permute.xlu0 %89 }
  0xb0   :  { %v1789_v59 = vpop.permute.xlu1 %368 }
  0xb1   :  { %154 = vperm.xlu1 %1339, %v1725_v37  }
  0xb2   :  { %v1792_v60 = vpop.permute.xlu0 %99 }
  0xb4   :  { %v1794_v61 = vpop.permute.xlu1 %412 }
  0xb5   :  { %1340 = vset.pattern.permute.xlu1 %v2395_v1 }
  0xb6   :  { %286 = vperm.xlu1 %1340, %v1725_v37   ;;  %v1798_v62 = vpop.permute.xlu0 %109 }
  0xb9   :  { %v1800_v63 = vpop.permute.xlu1 %518 }
  0xba   :  { %1341 = vset.pattern.permute.xlu1 %v1469_v6 }
  0xbb   :  { %v1803_v2 = vpop.permute.xlu0 %210  ;;  %392 = vperm.xlu1 %1341, %v1534_v8   ;;  %v172_v8 = vlaneseq }
  0xbd   :  { %v1806_v3 = vpop.permute.xlu1 %566  ;;  %v173_v15 = vshrl.u32 %v172_v8, 7 }
  0xbf   :  { %436 = vperm.xlu1 %1341, %v1623_v21   ;;  %v1809_v4 = vpop.permute.xlu0 %222  ;;  %v303_v22 = vsub.s32 1, %v173_v15  ;;  %v457_v26 = vsub.s32 2, %v173_v15  ;;  %v611_v33 = vsub.s32 3, %v173_v15 }
  0xc1   :  { %v1811_v5 = vpop.permute.xlu1 %570 }
  0xc3   :  { %1342 = vset.pattern.permute.xlu1 %v2391_v0  ;;  %v1814_v7 = vpop.permute.xlu0 %266 }
  0xc4   :  { %542 = vperm.xlu1 %1342, %v1581_v16   ;;  %v174_v16 = vsub.s32 0, %v173_v15 }
  0xc6   :  { %v1817_v9 = vpop.permute.xlu1 %74 }
  0xc7   :  { %v1819_v12 = vpop.permute.xlu0 %230 }
  0xc8   :  { %590 = vperm.xlu1 %1342, %v1623_v21   ;;  %v46_v21 = vld [vmem:[%s2385_s1] sm:$0xf] }
  0xc9   :  { %v1840_v28 = vrot.slane %v46_v21, %v174_v16  ;;  %v1844_v30 = vrot.slane %v46_v21, %v303_v22  ;;  %v1859_v22 = vrot.slane %v46_v21, %v611_v33 }
  0xcb   :  { %v1822_v13 = vpop.permute.xlu1 %218  ;;  %v1824_v14 = vpop.permute.xlu0 %274  ;;  %v177_v31 = vmul.f32 %v1840_v28, %v55_v51  ;;  %v306_v34 = vmul.f32 %v1844_v30, %v1727_v38  ;;  %v614_v38 = vmul.f32 %v1859_v22, %v1719_v36 }
  0xcc   :  { %594 = vperm.xlu1 %1342, %v1725_v37   ;;  %v1851_v37 = vrot.slane %v46_v21, %v457_v26  ;;  %v179_v21 = vmul.f32 %v1840_v28, %v1762_v48 }
  0xcd   :  { %v331_v16 = vadd.f32 %v306_v34, %v177_v31  ;;  %v308_v31 = vmul.f32 %v1844_v30, %v1767_v50  ;;  %v176_v34 = vmul.f32 %v1840_v28, %v1764_v49  ;;  %v190_v49 = vmul.f32 %v1840_v28, %v1770_v52 }
  0xce   :  { %v460_v51 = vmul.f32 %v1851_v37, %v1736_v41  ;;  %v319_v41 = vmul.f32 %v1844_v30, %v1778_v55  ;;  %v462_v36 = vmul.f32 %v1851_v37, %v1789_v59  ;;  %v473_v48 = vmul.f32 %v1851_v37, %v1794_v61  ;;  %v1888_v55 = vld [vmem:[%s2386_s2] ss:$0 sm:$0xff] }
  0xcf   :  { %v1827_v19 = vpop.permute.xlu0 %238  ;;  %v333_v50 = vadd.f32 %v308_v31, %v179_v21  ;;  %v616_v52 = vmul.f32 %v1859_v22, %v1729_v39  ;;  %v627_v61 = vmul.f32 %v1859_v22, %v1806_v3  ;;  %v613_v21 = vmul.f32 %v1859_v22, %v1748_v44 }
  0xd0   :  { %1343 = vset.pattern.permute.xlu1 %v2393_v11  ;;  %v1830_v20 = vpop.permute.xlu1 %129  ;;  %v485_v26 = vadd.f32 %v460_v51, %v331_v16  ;;  %v305_v16 = vmul.f32 %v1844_v30, %v1717_v35  ;;  %v307_v35 = vmul.f32 %v1844_v30, %v1803_v2  ;;  %v191_v39 = vmul.f32 %v1840_v28, %v1772_v53 }
  0xd1   :  { %104 = vperm.xlu1 %1343, %v1546_v10   ;;  %v487_v31 = vadd.f32 %v462_v36, %v333_v50  ;;  %v320_v44 = vmul.f32 %v1844_v30, %v1783_v57  ;;  %v310_v53 = vmul.f32 %v1844_v30, %v1809_v4  ;;  %v192_v4 = vmul.f32 %v1840_v28, %v1830_v20 }
  0xd2   :  { %v639_v51 = vadd.f32 %v614_v38, %v485_v26  ;;  %v344_v26 = vadd.f32 %v319_v41, %v190_v49  ;;  %v180_v41 = vmul.f32 %v1840_v28, %v1775_v54  ;;  %v181_v54 = vmul.f32 %v1840_v28, %v1817_v9 }
  0xd3   :  { %v1833_v23 = vpop.permute.xlu0 %282  ;;  %v615_v49 = vmul.f32 %v1859_v22, %v1800_v63  ;;  %v628_v20 = vmul.f32 %v1859_v22, %v1811_v5 }
  0xd4   :  { %v1838_v25 = vpop.permute.xlu1 %134  ;;  %v671_v2 = vadd.f32 %v1888_v55, %v639_v51  ;;  %v498_v3 = vadd.f32 %v473_v48, %v344_v26  ;;  %v345_v26 = vadd.f32 %v320_v44, %v191_v39 }
  0xd5   :  { %1344 = vset.pattern.permute.xlu1 %v2395_v1  ;;  %v193_v5 = vmul.f32 %v1840_v28, %v1838_v25 }
  0xd6   :  { %242 = vperm.xlu1 %1344, %v1588_v17   ;;  %v652_v50 = vadd.f32 %v627_v61, %v498_v3  ;;  %v696_v57 = vmax.f32 %v671_v2, 0.0 }
  0xd7   :  { %v1847_v32 = vpop.permute.xlu0 %246 }
  0xd9   :  { %v1853_v8 = vpop.permute.xlu1 %270 }
  0xda   :  { %1345 = vset.pattern.permute.xlu1 %v2393_v11  ;;  %v330_v11 = vadd.f32 %v305_v16, %v176_v34 }
  0xdb   :  { %159 = vperm.xlu1 %1345, %v1655_v27   ;;  %v1857_v24 = vpop.permute.xlu0 %290 }
  0xde   :  { %v377_v15 = vpop.permute.xlu1 %376 }
  0xdf   :  { %164 = vperm.xlu1 %1345, %v1742_v42   ;;  %v1866_v0 = vpop.permute.xlu0 %254 }
  0xe2   :  { %v421_v33 = vpop.permute.xlu1 %420 }
  0xe3   :  { %1346 = vset.pattern.permute.xlu1 %v2395_v1  ;;  %v178_v1 = vmul.f32 %v1840_v28, %v1754_v46 }
  0xe4   :  { %v357_v59 = vpop.permute.xlu0 %356  ;;  %294 = vperm.xlu1 %1346, %v1742_v42  }
  0xe5   :  { %v459_v38 = vmul.f32 %v1851_v37, %v357_v59  ;;  %v618_v59 = vmul.f32 %v1859_v22, %v1733_v40  ;;  %v641_v40 = vadd.f32 %v616_v52, %v487_v31  ;;  %v464_v52 = vmul.f32 %v1851_v37, %v377_v15 }
  0xe7   :  { %v484_v34 = vadd.f32 %v459_v38, %v330_v11  ;;  %v527_v16 = vpop.permute.xlu1 %526  ;;  %v332_v11 = vadd.f32 %v307_v35, %v178_v1  ;;  %v321_v35 = vmul.f32 %v1844_v30, %v1814_v7  ;;  %v475_v7 = vmul.f32 %v1851_v37, %v421_v33 }
  0xe8   :  { %v365_v36 = vpop.permute.xlu0 %364  ;;  %1347 = vset.pattern.permute.xlu1 %v1469_v6 }
  0xe9   :  { %v638_v46 = vadd.f32 %v613_v21, %v484_v34  ;;  %v461_v51 = vmul.f32 %v1851_v37, %v365_v36  ;;  %400 = vperm.xlu1 %1347, %v1546_v10   ;;  %v309_v10 = vmul.f32 %v1844_v30, %v1822_v13  ;;  %v684_v21 = vadd.f32 %v1888_v55, %v652_v50 }
  0xea   :  { %v335_v34 = vadd.f32 %v310_v53, %v181_v54  ;;  %v673_v13 = vadd.f32 %v1888_v55, %v641_v40  ;;  %v346_v44 = vadd.f32 %v321_v35, %v192_v4  ;;  %v2397_v53 = vmov 3  }
  0xeb   :  { %v486_v48 = vadd.f32 %v461_v51, %v332_v11  ;;  %v575_v38 = vpop.permute.xlu1 %574  ;;  %v670_v1 = vadd.f32 %v1888_v55, %v638_v46  ;;  %v334_v36 = vadd.f32 %v309_v10, %v180_v41  ;;  %v322_v11 = vmul.f32 %v1844_v30, %v1853_v8 }
  0xec   :  { %v417_v9 = vpop.permute.xlu0 %416  ;;  %v489_v46 = vadd.f32 %v464_v52, %v335_v34  ;;  %v629_v50 = vmul.f32 %v1859_v22, %v575_v38  ;;  %v500_v54 = vadd.f32 %v475_v7, %v346_v44  ;;  %v2398_v41 = vmov 0.0  }
  0xed   :  { %v640_v31 = vadd.f32 %v615_v49, %v486_v48  ;;  %v474_v63 = vmul.f32 %v1851_v37, %v417_v9  ;;  %444 = vperm.xlu1 %1347, %v1655_v27   ;;  %v695_v61 = vmax.f32 %v670_v1, 0.0  ;;  %v617_v8 = vmul.f32 %v1859_v22, %v527_v16 }
  0xee   :  { %v347_v1 = vadd.f32 %v322_v11, %v193_v5  ;;  %v698_v4 = vmax.f32 %v673_v13, 0.0  ;;  %v709_v52 = vmax.f32 %v684_v21, 0.0  ;;  %v654_v9 = vadd.f32 %v629_v50, %v500_v54 }
  0xef   :  { %v499_v2 = vadd.f32 %v474_v63, %v345_v26  ;;  %v579_v15 = vpop.permute.xlu1 %578  ;;  %v720_v3 = vpack.c.bf16 %v696_v57, %v695_v61  ;;  %v672_v39 = vadd.f32 %v1888_v55, %v640_v31  ;;  %v643_v57 = vadd.f32 %v618_v59, %v489_v46 }
  0xf0   :  { %v373_v51 = vpop.permute.xlu0 %372  ;;  %v630_v31 = vmul.f32 %v1859_v22, %v579_v15  ;;  %v686_v59 = vadd.f32 %v1888_v55, %v654_v9  ;;  %v2400_v46 = vmov 1  }
  0xf1   :  { %v653_v33 = vadd.f32 %v628_v20, %v499_v2  ;;  %v463_v40 = vmul.f32 %v1851_v37, %v373_v51  ;;  %1348 = vset.pattern.permute.xlu1 %v2397_v53  ;;  %1242 = vmatmul.mubr.bf16.vlgmr.msra.gmra.mrb[0].mxu0 %v720_v3  ;;  %v697_v48 = vmax.f32 %v672_v39, 0.0  ;;  %v675_v13 = vadd.f32 %v1888_v55, %v643_v57  ;;  %v45_v51 = vld [vmem:[%s2383_s0 + $0xc0] sm:$0xff] }
  0xf2   :  { %550 = vperm.xlu1 %1348, %v1588_v17   ;;  %1245 = vmatprep.mubr.msk.bf16.mxu0 %vm1472_vm0, %v2398_v41  ;;  %v711_v15 = vmax.f32 %v686_v59, 0.0  ;;  %v2399_v39 = vmov 0  }
  0xf3   :  { %v488_v49 = vadd.f32 %v463_v40, %v334_v36  ;;  %v685_v38 = vadd.f32 %v1888_v55, %v653_v33  ;;  %v721_v63 = vpack.c.bf16 %v698_v4, %v697_v48  ;;  %v700_v2 = vmax.f32 %v675_v13, 0.0 }
  0xf4   :  { %v425_v35 = vpop.permute.xlu0 %424  ;;  %v85_v10 = vpop.permute.xlu1 %84  ;;  %v312_v33 = vmul.f32 %v1844_v30, %v1819_v12  ;;  %v620_v12 = vmul.f32 %v1859_v22, %v1745_v43 }
  0xf5   :  { %v642_v25 = vadd.f32 %v617_v8, %v488_v49  ;;  %v476_v26 = vmul.f32 %v1851_v37, %v425_v35  ;;  %v710_v17 = vmax.f32 %v685_v38, 0.0  ;;  %v183_v40 = vmul.f32 %v1840_v28, %v85_v10 }
  0xf6   :  { %598 = vperm.xlu1 %1348, %v1655_v27  }
  0xf7   :  { %v501_v16 = vadd.f32 %v476_v26, %v347_v1  ;;  %v727_v61 = vpack.c.bf16 %v710_v17, %v709_v52  ;;  %v674_v34 = vadd.f32 %v1888_v55, %v642_v25  ;;  %v337_v8 = vadd.f32 %v312_v33, %v183_v40 }
  0xf8   :  { %v381_v48 = vpop.permute.xlu0 %380 }
  0xf9   :  { %v655_v7 = vadd.f32 %v630_v31, %v501_v16  ;;  %1246 = vmatmul.mubr.bf16.gmra.mrb[4].mxu0 %v721_v63  ;;  %1270 = vmatmul.mubr.bf16.vlgmr.msra.gmra.mrb[0].mxu1 %v727_v61  ;;  %v227_v21 = vpop.permute.xlu1 %226  ;;  %v699_v27 = vmax.f32 %v674_v34, 0.0  ;;  %v465_v35 = vmul.f32 %v1851_v37, %v381_v48 }
  0xfa   :  { %602 = vperm.xlu1 %1348, %v1742_v42   ;;  %1249 = vmatprep.mubr.msk.bf16.mxu0 %vm1472_vm0, %v2398_v41  ;;  %v311_v49 = vmul.f32 %v1844_v30, %v227_v21 }
  0xfb   :  { %1273 = vmatprep.mubr.msk.bf16.mxu1 %vm1472_vm0, %v2398_v41  ;;  %v687_v20 = vadd.f32 %v1888_v55, %v655_v7  ;;  %v722_v44 = vpack.c.bf16 %v700_v2, %v699_v27 }
  0xfc   :  { %v433_v26 = vpop.permute.xlu0 %432 }
  0xfd   :  { %v712_v3 = vmax.f32 %v687_v20, 0.0 }
  0xfe   :  { %1351 = vset.pattern.permute.xlu1 %v2399_v39  ;;  %v140_v36 = vpop.permute.xlu1 %139 }
  0xff   :  { %114 = vperm.xlu1 %1351, %v1667_v29   ;;  %v728_v11 = vpack.c.bf16 %v712_v3, %v711_v15  ;;  %v194_v10 = vmul.f32 %v1840_v28, %v140_v36 }
 0x101   :  { %1250 = vmatmul.mubr.bf16.gmra.mrb[8].mxu0 %v722_v44  ;;  %1274 = vmatmul.mubr.bf16.gmra.mrb[4].mxu1 %v728_v11 }
 0x102   :  { %v145_v42 = vpop.permute.xlu1 %144  ;;  %1253 = vmatprep.mubr.msk.bf16.mxu0 %vm1472_vm0, %v2398_v41  ;;  %1277 = vmatprep.mubr.msk.bf16.mxu1 %vm1472_vm0, %v2398_v41 }
 0x103   :  { %1352 = vset.pattern.permute.xlu1 %v2400_v46 }
 0x104   :  { %250 = vperm.xlu1 %1352, %v1594_v18   ;;  %v182_v18 = vmul.f32 %v1840_v28, %v1781_v56  ;;  %v323_v56 = vmul.f32 %v1844_v30, %v1824_v14  ;;  %v478_v14 = vmul.f32 %v1851_v37, %v433_v26 }
 0x106   :  { %v336_v57 = vadd.f32 %v311_v49, %v182_v18  ;;  %v348_v31 = vadd.f32 %v323_v56, %v194_v10  ;;  %v325_v10 = vmul.f32 %v1844_v30, %v1833_v23 }
 0x107   :  { %v279_v50 = vpop.permute.xlu1 %278 }
 0x108   :  { %1354 = vset.pattern.permute.xlu1 %v2399_v39  ;;  %v490_v9 = vadd.f32 %v465_v35, %v336_v57  ;;  %v324_v25 = vmul.f32 %v1844_v30, %v279_v50  ;;  %v622_v35 = vmul.f32 %v1859_v22, %v1751_v45 }
 0x109   :  { %169 = vperm.xlu1 %1354, %v45_v51  }
 0x10c   :  { %v385_v5 = vpop.permute.xlu1 %384 }
 0x10d   :  { %v466_v54 = vmul.f32 %v1851_v37, %v385_v5  ;;  %1355 = vset.pattern.permute.xlu1 %v2400_v46 }
 0x10e   :  { %298 = vperm.xlu1 %1355, %v45_v51  }
 0x10f   :  { %v491_v38 = vadd.f32 %v466_v54, %v337_v8 }
 0x110   :  { %v429_v1 = vpop.permute.xlu1 %428 }
 0x111   :  { %v645_v4 = vadd.f32 %v620_v12, %v491_v38  ;;  %v477_v43 = vmul.f32 %v1851_v37, %v429_v1  ;;  %v389_v38 = vpop.permute.xlu0 %388  ;;  %v184_v1 = vmul.f32 %v1840_v28, %v1787_v58 }
 0x112   :  { %1356 = vset.pattern.permute.xlu1 %v1469_v6  ;;  %v195_v6 = vmul.f32 %v1840_v28, %v145_v42 }
 0x113   :  { %408 = vperm.xlu1 %1356, %v1667_v29   ;;  %v677_v63 = vadd.f32 %v1888_v55, %v645_v4  ;;  %v502_v59 = vadd.f32 %v477_v43, %v348_v31 }
 0x114   :  { %v349_v34 = vadd.f32 %v324_v25, %v195_v6 }
 0x115   :  { %v535_v52 = vpop.permute.xlu1 %534  ;;  %v702_v20 = vmax.f32 %v677_v63, 0.0  ;;  %v441_v43 = vpop.permute.xlu0 %440 }
 0x116   :  { %v619_v17 = vmul.f32 %v1859_v22, %v535_v52  ;;  %v503_v15 = vadd.f32 %v478_v14, %v349_v34  ;;  %v480_v23 = vmul.f32 %v1851_v37, %v441_v43 }
 0x117   :  { %452 = vperm.xlu1 %1356, %v45_v51  }
 0x118   :  { %v644_v16 = vadd.f32 %v619_v17, %v490_v9 }
 0x119   :  { %v583_v61 = vpop.permute.xlu1 %582 }
 0x11a   :  { %v676_v7 = vadd.f32 %v1888_v55, %v644_v16  ;;  %v631_v21 = vmul.f32 %v1859_v22, %v583_v61 }
 0x11b   :  { %1358 = vset.pattern.permute.xlu1 %v2397_v53 }
 0x11c   :  { %v656_v13 = vadd.f32 %v631_v21, %v502_v59  ;;  %562 = vperm.xlu1 %1358, %v1667_v29   ;;  %v701_v27 = vmax.f32 %v676_v7, 0.0 }
 0x11d   :  { %v587_v2 = vpop.permute.xlu1 %586 }
 0x11e   :  { %v632_v3 = vmul.f32 %v1859_v22, %v587_v2  ;;  %v723_v39 = vpack.c.bf16 %v702_v20, %v701_v27  ;;  %v688_v36 = vadd.f32 %v1888_v55, %v656_v13 }
 0x120   :  { %v657_v44 = vadd.f32 %v632_v3, %v503_v15  ;;  %606 = vperm.xlu1 %1358, %v45_v51   ;;  %1254 = vmatmul.mubr.bf16.gmra.mrb[12].mxu0 %v723_v39  ;;  %v713_v42 = vmax.f32 %v688_v36, 0.0  ;;  %v314_v51 = vmul.f32 %v1844_v30, %v1827_v19  ;;  %v467_v19 = vmul.f32 %v1851_v37, %v389_v38 }
 0x121   :  { %1257 = vmatprep.mubr.msk.bf16.mxu0 %vm1472_vm0, %v2398_v41 }
 0x122   :  { %v689_v53 = vadd.f32 %v1888_v55, %v657_v44  ;;  %v95_v11 = vpop.permute.xlu1 %94 }
 0x123   :  { %v185_v54 = vmul.f32 %v1840_v28, %v95_v11 }
 0x124   :  { %v714_v29 = vmax.f32 %v689_v53, 0.0 }
 0x125   :  { %v339_v49 = vadd.f32 %v314_v51, %v185_v54 }
 0x126   :  { %v729_v46 = vpack.c.bf16 %v714_v29, %v713_v42 }
 0x127   :  { %v235_v50 = vpop.permute.xlu1 %234 }
 0x128   :  { %1278 = vmatmul.mubr.bf16.gmra.mrb[8].mxu1 %v729_v46  ;;  %v313_v48 = vmul.f32 %v1844_v30, %v235_v50 }
 0x129   :  { %1281 = vmatprep.mubr.msk.bf16.mxu1 %vm1472_vm0, %v2398_v41 }
 0x12a   :  { %v338_v56 = vadd.f32 %v313_v48, %v184_v1  ;;  %v186_v48 = vmul.f32 %v1840_v28, %v1792_v60 }
 0x12c   :  { %v150_v33 = vpop.permute.xlu1 %149  ;;  %v492_v25 = vadd.f32 %v467_v19, %v338_v56  ;;  %v327_v19 = vmul.f32 %v1844_v30, %v1857_v24 }
 0x12d   :  { %v196_v4 = vmul.f32 %v1840_v28, %v150_v33 }
 0x12f   :  { %v350_v31 = vadd.f32 %v325_v10, %v196_v4 }
 0x130   :  { %v155_v40 = vpop.permute.xlu1 %154 }
 0x131   :  { %v197_v45 = vmul.f32 %v1840_v28, %v155_v40 }
 0x135   :  { %v287_v5 = vpop.permute.xlu1 %286 }
 0x136   :  { %v326_v26 = vmul.f32 %v1844_v30, %v287_v5  ;;  %v316_v5 = vmul.f32 %v1844_v30, %v1847_v32 }
 0x138   :  { %v351_v14 = vadd.f32 %v326_v26, %v197_v45 }
 0x13a   :  { %v393_v18 = vpop.permute.xlu1 %392  ;;  %v505_v20 = vadd.f32 %v480_v23, %v351_v14 }
 0x13b   :  { %v468_v8 = vmul.f32 %v1851_v37, %v393_v18 }
 0x13d   :  { %v493_v12 = vadd.f32 %v468_v8, %v339_v49  ;;  %v397_v49 = vpop.permute.xlu0 %396 }
 0x13e   :  { %v437_v57 = vpop.permute.xlu1 %436 }
 0x13f   :  { %v647_v52 = vadd.f32 %v622_v35, %v493_v12  ;;  %v479_v58 = vmul.f32 %v1851_v37, %v437_v57  ;;  %v624_v12 = vmul.f32 %v1859_v22, %v1757_v47  ;;  %v469_v35 = vmul.f32 %v1851_v37, %v397_v49 }
 0x141   :  { %v679_v16 = vadd.f32 %v1888_v55, %v647_v52  ;;  %v504_v61 = vadd.f32 %v479_v58, %v350_v31  ;;  %v449_v26 = vpop.permute.xlu0 %448 }
 0x143   :  { %v543_v9 = vpop.permute.xlu1 %542  ;;  %v704_v13 = vmax.f32 %v679_v16, 0.0 }
 0x144   :  { %v621_v17 = vmul.f32 %v1859_v22, %v543_v9 }
 0x146   :  { %v646_v6 = vadd.f32 %v621_v17, %v492_v25  ;;  %v482_v17 = vmul.f32 %v1851_v37, %v449_v26 }
 0x147   :  { %v591_v63 = vpop.permute.xlu1 %590 }
 0x148   :  { %v678_v34 = vadd.f32 %v1888_v55, %v646_v6  ;;  %v633_v59 = vmul.f32 %v1859_v22, %v591_v63 }
 0x14a   :  { %v703_v7 = vmax.f32 %v678_v34, 0.0  ;;  %v658_v21 = vadd.f32 %v633_v59, %v504_v61 }
 0x14b   :  { %v595_v27 = vpop.permute.xlu1 %594 }
 0x14c   :  { %v634_v2 = vmul.f32 %v1859_v22, %v595_v27  ;;  %v724_v15 = vpack.c.bf16 %v704_v13, %v703_v7  ;;  %v690_v3 = vadd.f32 %v1888_v55, %v658_v21 }
 0x14e   :  { %v659_v39 = vadd.f32 %v634_v2, %v505_v20  ;;  %1258 = vmatmul.mubr.bf16.gmra.mrb[16].mxu0 %v724_v15  ;;  %v715_v53 = vmax.f32 %v690_v3, 0.0 }
 0x14f   :  { %1261 = vmatprep.mubr.msk.bf16.mxu0 %vm1472_vm0, %v2398_v41 }
 0x150   :  { %v691_v36 = vadd.f32 %v1888_v55, %v659_v39  ;;  %v105_v44 = vpop.permute.xlu1 %104 }
 0x151   :  { %v187_v40 = vmul.f32 %v1840_v28, %v105_v44 }
 0x152   :  { %v716_v11 = vmax.f32 %v691_v36, 0.0 }
 0x153   :  { %v341_v18 = vadd.f32 %v316_v5, %v187_v40 }
 0x154   :  { %v730_v42 = vpack.c.bf16 %v716_v11, %v715_v53  ;;  %v405_v11 = vpop.permute.xlu0 %404 }
 0x155   :  { %v243_v29 = vpop.permute.xlu1 %242 }
 0x156   :  { %1282 = vmatmul.mubr.bf16.gmra.mrb[12].mxu1 %v730_v42  ;;  %v315_v8 = vmul.f32 %v1844_v30, %v243_v29  ;;  %v188_v42 = vmul.f32 %v1840_v28, %v1798_v62 }
 0x157   :  { %1285 = vmatprep.mubr.msk.bf16.mxu1 %vm1472_vm0, %v2398_v41 }
 0x158   :  { %v340_v57 = vadd.f32 %v315_v8, %v186_v48 }
 0x15a   :  { %v160_v46 = vpop.permute.xlu1 %159  ;;  %v494_v4 = vadd.f32 %v469_v35, %v340_v57 }
 0x15b   :  { %v198_v32 = vmul.f32 %v1840_v28, %v160_v46 }
 0x15d   :  { %v352_v25 = vadd.f32 %v327_v19, %v198_v32 }
 0x15e   :  { %v165_v50 = vpop.permute.xlu1 %164 }
 0x15f   :  { %v199_v47 = vmul.f32 %v1840_v28, %v165_v50  ;;  %v559_v50 = vpop.permute.xlu0 %558 }
 0x163   :  { %v295_v33 = vpop.permute.xlu1 %294 }
 0x164   :  { %v328_v52 = vmul.f32 %v1844_v30, %v295_v33  ;;  %v471_v33 = vmul.f32 %v1851_v37, %v405_v11 }
 0x166   :  { %v353_v45 = vadd.f32 %v328_v52, %v199_v47  ;;  %v2081_v47 = vld [vmem:[%s2387_s4] ss:$0 sm:$0xff] }
 0x168   :  { %v401_v51 = vpop.permute.xlu1 %400  ;;  %v507_v34 = vadd.f32 %v482_v17, %v353_v45 }
 0x169   :  { %v470_v54 = vmul.f32 %v1851_v37, %v401_v51  ;;  %v625_v51 = vmul.f32 %v1859_v22, %v559_v50 }
 0x16b   :  { %v495_v38 = vadd.f32 %v470_v54, %v341_v18 }
 0x16c   :  { %v445_v1 = vpop.permute.xlu1 %444 }
 0x16d   :  { %v649_v56 = vadd.f32 %v624_v12, %v495_v38  ;;  %v481_v60 = vmul.f32 %v1851_v37, %v445_v1 }
 0x16f   :  { %v681_v58 = vadd.f32 %v1888_v55, %v649_v56  ;;  %v506_v24 = vadd.f32 %v481_v60, %v352_v25 }
 0x171   :  { %v551_v10 = vpop.permute.xlu1 %550  ;;  %v706_v14 = vmax.f32 %v681_v58, 0.0 }
 0x172   :  { %v623_v9 = vmul.f32 %v1859_v22, %v551_v10 }
 0x174   :  { %v648_v43 = vadd.f32 %v623_v9, %v494_v4 }
 0x175   :  { %v599_v31 = vpop.permute.xlu1 %598 }
 0x176   :  { %v680_v6 = vadd.f32 %v1888_v55, %v648_v43  ;;  %v635_v16 = vmul.f32 %v1859_v22, %v599_v31 }
 0x178   :  { %v705_v23 = vmax.f32 %v680_v6, 0.0  ;;  %v660_v63 = vadd.f32 %v635_v16, %v506_v24 }
 0x179   :  { %v603_v61 = vpop.permute.xlu1 %602 }
 0x17a   :  { %v636_v59 = vmul.f32 %v1859_v22, %v603_v61  ;;  %v725_v7 = vpack.c.bf16 %v706_v14, %v705_v23  ;;  %v692_v21 = vadd.f32 %v1888_v55, %v660_v63 }
 0x17c   :  { %v661_v13 = vadd.f32 %v636_v59, %v507_v34  ;;  %1262 = vmatmul.mubr.bf16.gmra.mrb[20].mxu0 %v725_v7  ;;  %v717_v2 = vmax.f32 %v692_v21, 0.0 }
 0x17d   :  { %1265 = vmatprep.mubr.msk.bf16.mxu0 %vm1472_vm0, %v2398_v41 }
 0x17e   :  { %v693_v27 = vadd.f32 %v1888_v55, %v661_v13  ;;  %v115_v20 = vpop.permute.xlu1 %114 }
 0x17f   :  { %v189_v40 = vmul.f32 %v1840_v28, %v115_v20 }
 0x180   :  { %v718_v15 = vmax.f32 %v693_v27, 0.0 }
 0x182   :  { %v731_v3 = vpack.c.bf16 %v718_v15, %v717_v2 }
 0x183   :  { %v251_v39 = vpop.permute.xlu1 %250 }
 0x184   :  { %1286 = vmatmul.mubr.bf16.gmra.mrb[16].mxu1 %v731_v3  ;;  %v317_v53 = vmul.f32 %v1844_v30, %v251_v39 }
 0x185   :  { %1289 = vmatprep.mubr.msk.bf16.mxu1 %vm1472_vm0, %v2398_v41  ;;  %v318_v41 = vmul.f32 %v1844_v30, %v1866_v0 }
 0x186   :  { %v342_v29 = vadd.f32 %v317_v53, %v188_v42 }
 0x187   :  { %v343_v8 = vadd.f32 %v318_v41, %v189_v40 }
 0x188   :  { %v170_v36 = vpop.permute.xlu1 %169  ;;  %v496_v5 = vadd.f32 %v471_v33, %v342_v29 }
 0x189   :  { %v200_v38 = vmul.f32 %v1840_v28, %v170_v36 }
 0x18a   :  { %v650_v49 = vadd.f32 %v625_v51, %v496_v5 }
 0x18c   :  { %v682_v35 = vadd.f32 %v1888_v55, %v650_v49 }
 0x18d   :  { %v299_v44 = vpop.permute.xlu1 %298 }
 0x18e   :  { %v329_v62 = vmul.f32 %v1844_v30, %v299_v44  ;;  %v707_v52 = vmax.f32 %v682_v35, 0.0 }
 0x190   :  { %v354_v32 = vadd.f32 %v329_v62, %v200_v38 }
 0x192   :  { %v409_v46 = vpop.permute.xlu1 %408 }
 0x193   :  { %v472_v18 = vmul.f32 %v1851_v37, %v409_v46 }
 0x195   :  { %v497_v1 = vadd.f32 %v472_v18, %v343_v8 }
 0x196   :  { %v453_v54 = vpop.permute.xlu1 %452 }
 0x197   :  { %v483_v12 = vmul.f32 %v1851_v37, %v453_v54 }
 0x199   :  { %v508_v0 = vadd.f32 %v483_v12, %v354_v32 }
 0x19b   :  { %v563_v48 = vpop.permute.xlu1 %562 }
 0x19c   :  { %v626_v57 = vmul.f32 %v1859_v22, %v563_v48 }
 0x19e   :  { %v651_v56 = vadd.f32 %v626_v57, %v497_v1 }
 0x19f   :  { %v607_v19 = vpop.permute.xlu1 %606 }
 0x1a0   :  { %v683_v10 = vadd.f32 %v1888_v55, %v651_v56  ;;  %v637_v4 = vmul.f32 %v1859_v22, %v607_v19 }
 0x1a2   :  { %v708_v30 = vmax.f32 %v683_v10, 0.0  ;;  %v662_v60 = vadd.f32 %v637_v4, %v508_v0 }
 0x1a4   :  { %v694_v28 = vadd.f32 %v1888_v55, %v662_v60  ;;  %v726_v9 = vpack.c.bf16 %v708_v30, %v707_v52 }
 0x1a6   :  { %1266 = vmatmul.mubr.bf16.gmra.mrb[24].mxu0 %v726_v9  ;;  %v719_v37 = vmax.f32 %v694_v28, 0.0 }
 0x1a8   :  { %v732_v25 = vpack.c.bf16 %v719_v37, %v719_v37 }
 0x1aa   :  { %1290 = vmatmul.mubr.bf16.gmra.mrb[20].mxu1 %v732_v25 }
 0x1c4   :  { %v838_v26 = vpop.f32.mrb[0].mxu0 }
 0x1c5   :  { %v2084_v43 = vadd.f32 %v2081_v47, %v838_v26  ;;  %v1243_v22 = vpop.f32.mrb[1].mxu0 }
 0x1c6   :  { %v841_v58 = vpop.f32.mrb[2].mxu0 }
 0x1c7   :  { %940 = vmax.xlane.f32.xlu0 %v2084_v43  ;;  %v1244_v17 = vpop.f32.mrb[3].mxu0  ;;  %v2095_v34 = vadd.f32 %v2081_v47, %v841_v58 }
 0x1cc   :  { %v846_v55 = vpop.f32.mrb[4].mxu0  ;;  %v894_v31 = vpop.f32.mrb[0].mxu1 }
 0x1cd   :  { %v2088_v45 = vadd.f32 %v2081_v47, %v894_v31  ;;  %v1247_v24 = vpop.f32.mrb[5].mxu0  ;;  %v1271_v6 = vpop.f32.mrb[1].mxu1  ;;  %v2099_v59 = vadd.f32 %v2081_v47, %v846_v55 }
 0x1ce   :  { %v849_v16 = vpop.f32.mrb[6].mxu0  ;;  %v897_v23 = vpop.f32.mrb[2].mxu1 }
 0x1cf   :  { %v2091_v63 = vadd.f32 %v2081_v47, %v897_v23  ;;  %v1248_v14 = vpop.f32.mrb[7].mxu0  ;;  %968 = vmax.xlane.f32.xlu1 %v2088_v45  ;;  %v1272_v61 = vpop.f32.mrb[3].mxu1  ;;  %v2107_v3 = vadd.f32 %v2081_v47, %v849_v16 }
 0x1d1   :  { %970 = vmax.xlane.f32.xlu0 %v2091_v63 }
 0x1d3   :  { %942 = vmax.xlane.f32.xlu1 %v2095_v34 }
 0x1d4   :  { %v854_v7 = vpop.f32.mrb[8].mxu0  ;;  %v902_v21 = vpop.f32.mrb[4].mxu1 }
 0x1d5   :  { %v2103_v13 = vadd.f32 %v2081_v47, %v902_v21  ;;  %944 = vmax.xlane.f32.xlu0 %v2099_v59  ;;  %v1251_v27 = vpop.f32.mrb[9].mxu0  ;;  %v1275_v20 = vpop.f32.mrb[5].mxu1  ;;  %v2111_v44 = vadd.f32 %v2081_v47, %v854_v7 }
 0x1d6   :  { %v857_v2 = vpop.f32.mrb[10].mxu0  ;;  %v905_v15 = vpop.f32.mrb[6].mxu1 }
 0x1d7   :  { %v1252_v39 = vpop.f32.mrb[11].mxu0  ;;  %972 = vmax.xlane.f32.xlu1 %v2103_v13  ;;  %v1276_v36 = vpop.f32.mrb[7].mxu1  ;;  %v2115_v53 = vadd.f32 %v2081_v47, %v905_v15  ;;  %v2120_v11 = vadd.f32 %v2081_v47, %v857_v2 }
 0x1d9   :  { %946 = vmax.xlane.f32.xlu0 %v2107_v3 }
 0x1db   :  { %948 = vmax.xlane.f32.xlu1 %v2111_v44 }
 0x1dd   :  { %974 = vmax.xlane.f32.xlu0 %v2115_v53 }
 0x1e1   :  { %950 = vmax.xlane.f32.xlu0 %v2120_v11 }
 0x1f3   :  { %v862_v42 = vpop.f32.mrb[12].mxu0 }
 0x1f4   :  { %v1255_v29 = vpop.f32.mrb[13].mxu0  ;;  %v2131_v18 = vadd.f32 %v2081_v47, %v862_v42 }
 0x1f5   :  { %v865_v46 = vpop.f32.mrb[14].mxu0 }
 0x1f6   :  { %v1256_v50 = vpop.f32.mrb[15].mxu0  ;;  %v2135_v8 = vadd.f32 %v2081_v47, %v865_v46 }
 0x1fb   :  { %v910_v33 = vpop.f32.mrb[8].mxu1 }
 0x1fc   :  { %v2124_v40 = vadd.f32 %v2081_v47, %v910_v33  ;;  %v1279_v5 = vpop.f32.mrb[9].mxu1 }
 0x1fd   :  { %v913_v51 = vpop.f32.mrb[10].mxu1 }
 0x1fe   :  { %v2127_v54 = vadd.f32 %v2081_v47, %v913_v51  ;;  %976 = vmax.xlane.f32.xlu1 %v2124_v40  ;;  %v1280_v41 = vpop.f32.mrb[11].mxu1 }
 0x200   :  { %978 = vmax.xlane.f32.xlu0 %v2127_v54 }
 0x202   :  { %952 = vmax.xlane.f32.xlu1 %v2131_v18 }
 0x204   :  { %954 = vmax.xlane.f32.xlu0 %v2135_v8 }
 0x221   :  { %v870_v49 = vpop.f32.mrb[16].mxu0 }
 0x222   :  { %v1259_v62 = vpop.f32.mrb[17].mxu0  ;;  %v2147_v19 = vadd.f32 %v2081_v47, %v870_v49 }
 0x223   :  { %v873_v48 = vpop.f32.mrb[18].mxu0 }
 0x224   :  { %v1260_v38 = vpop.f32.mrb[19].mxu0  ;;  %v2151_v0 = vadd.f32 %v2081_v47, %v873_v48 }
 0x229   :  { %v918_v1 = vpop.f32.mrb[12].mxu1 }
 0x22a   :  { %v2140_v12 = vadd.f32 %v2081_v47, %v918_v1  ;;  %v1283_v57 = vpop.f32.mrb[13].mxu1 }
 0x22b   :  { %v921_v35 = vpop.f32.mrb[14].mxu1 }
 0x22c   :  { %v2143_v32 = vadd.f32 %v2081_v47, %v921_v35  ;;  %980 = vmax.xlane.f32.xlu1 %v2140_v12  ;;  %v1284_v56 = vpop.f32.mrb[15].mxu1 }
 0x22e   :  { %982 = vmax.xlane.f32.xlu0 %v2143_v32 }
 0x230   :  { %956 = vmax.xlane.f32.xlu1 %v2147_v19 }
 0x232   :  { %958 = vmax.xlane.f32.xlu0 %v2151_v0 }
 0x24f   :  { %v878_v10 = vpop.f32.mrb[20].mxu0 }
 0x250   :  { %v1263_v4 = vpop.f32.mrb[21].mxu0  ;;  %v2164_v22 = vadd.f32 %v2081_v47, %v878_v10 }
 0x251   :  { %v881_v52 = vpop.f32.mrb[22].mxu0 }
 0x252   :  { %v2156_v30 = vadd.f32 %v2081_v47, %v881_v52  ;;  %v1264_v60 = vpop.f32.mrb[23].mxu0 }
 0x254   :  { %962 = vmax.xlane.f32.xlu0 %v2156_v30  ;;  %v941_v58 = vpop.xlane.xlu0 %940 }
 0x255   :  { %v990_v23 = vsub.f32 %v2084_v43, %v941_v58 }
 0x257   :  { %v926_v28 = vpop.f32.mrb[16].mxu1  ;;  %v1015_v7 = vmul.f32 1.442695, %v990_v23 }
 0x258   :  { %v2160_v9 = vadd.f32 %v2081_v47, %v926_v28  ;;  %v1287_v37 = vpop.f32.mrb[17].mxu1 }
 0x259   :  { %v929_v25 = vpop.f32.mrb[18].mxu1 }
 0x25a   :  { %984 = vmax.xlane.f32.xlu1 %v2160_v9  ;;  %v1288_v26 = vpop.f32.mrb[19].mxu1  ;;  %v2187_v62 = vadd.f32 %v2081_v47, %v929_v25 }
 0x25c   :  { %v969_v55 = vpop.xlane.xlu1 %968 }
 0x25d   :  { %v1004_v21 = vsub.f32 %v2088_v45, %v969_v55 }
 0x25e   :  { %960 = vmax.xlane.f32.xlu1 %v2164_v22  ;;  %v971_v17 = vpop.xlane.xlu0 %970 }
 0x25f   :  { %v1005_v14 = vsub.f32 %v2091_v63, %v971_v17  ;;  %v1043_v42 = vmul.f32 1.442695, %v1004_v21 }
 0x260   :  { %v943_v24 = vpop.xlane.xlu1 %942 }
 0x261   :  { %v991_v6 = vsub.f32 %v2095_v34, %v943_v24  ;;  %v1045_v20 = vmul.f32 1.442695, %v1005_v14 }
 0x262   :  { %v945_v31 = vpop.xlane.xlu0 %944 }
 0x263   :  { %v1017_v61 = vmul.f32 1.442695, %v991_v6  ;;  %v992_v43 = vsub.f32 %v2099_v59, %v945_v31 }
 0x264   :  { %v973_v39 = vpop.xlane.xlu1 %972 }
 0x265   :  { %1367 = vpow2.f32 %v1017_v61  ;;  %v1019_v59 = vmul.f32 1.442695, %v992_v43  ;;  %v1006_v41 = vsub.f32 %v2103_v13, %v973_v39 }
 0x266   :  { %v947_v16 = vpop.xlane.xlu0 %946  ;;  %1369 = vpow2.f32 %v1015_v7 }
 0x267   :  { %v993_v2 = vsub.f32 %v2107_v3, %v947_v16  ;;  %1371 = vpow2.f32 %v1045_v20  ;;  %v1047_v35 = vmul.f32 1.442695, %v1006_v41 }
 0x268   :  { %1373 = vpow2.f32 %v1043_v42  ;;  %v949_v48 = vpop.xlane.xlu1 %948 }
 0x269   :  { %v1021_v46 = vmul.f32 1.442695, %v993_v2  ;;  %v994_v13 = vsub.f32 %v2111_v44, %v949_v48 }
 0x26a   :  { %v975_v27 = vpop.xlane.xlu0 %974 }
 0x26b   :  { %v1007_v3 = vsub.f32 %v2115_v53, %v975_v27  ;;  %1375 = vpow2.f32 %v1021_v46 }
 0x26c   :  { %1377 = vpow2.f32 %v1019_v59 }
 0x26d   :  { %v1049_v38 = vmul.f32 1.442695, %v1007_v3 }
 0x26e   :  { %v951_v33 = vpop.xlane.xlu0 %950 }
 0x26f   :  { %v995_v1 = vsub.f32 %v2120_v11, %v951_v33  ;;  %v2192_v57 = vpop.eup %1367  ;;  %1379 = vpow2.f32 %v1049_v38  ;;  %v1023_v11 = vmul.f32 1.442695, %v994_v13 }
 0x270   :  { %1381 = vpow2.f32 %v1047_v35 }
 0x271   :  { %v1025_v56 = vmul.f32 1.442695, %v995_v1 }
 0x273   :  { %1383 = vpow2.f32 %v1025_v56 }
 0x274   :  { %1385 = vpow2.f32 %v1023_v11 }
 0x279   :  { %v886_v15 = vpop.f32.mrb[24].mxu0 }
 0x27a   :  { %v2173_v36 = vadd.f32 %v2081_v47, %v886_v15  ;;  %v1267_v34 = vpop.f32.mrb[25].mxu0 }
 0x27b   :  { %v889_v63 = vpop.f32.mrb[26].mxu0 }
 0x27c   :  { %v2177_v29 = vadd.f32 %v2081_v47, %v889_v63  ;;  %964 = vmax.xlane.f32.xlu1 %v2173_v36  ;;  %v1268_v45 = vpop.f32.mrb[27].mxu0 }
 0x27d   :  { %v934_v50 = vpop.f32.mrb[20].mxu1 }
 0x27e   :  { %v2182_v5 = vadd.f32 %v2081_v47, %v934_v50  ;;  %966 = vmax.xlane.f32.xlu0 %v2177_v29  ;;  %v1291_v51 = vpop.f32.mrb[21].mxu1  ;;  %v2196_v47 = vpop.eup %1369 }
 0x27f   :  { %v937_v49 = vpop.f32.mrb[22].mxu1  ;;  %v2199_v10 = vpop.eup %1371 }
 0x280   :  { %988 = vmax.xlane.f32.xlu1 %v2182_v5  ;;  %v1292_v53 = vpop.f32.mrb[23].mxu1  ;;  %v2202_v4 = vpop.eup %1373 }
 0x281   :  { %v2205_v44 = vpop.eup %1375 }
 0x282   :  { %986 = vmax.xlane.f32.xlu0 %v2187_v62  ;;  %v2209_v28 = vpop.eup %1377 }
 0x283   :  { %v2213_v58 = vpop.eup %1379 }
 0x284   :  { %1067 = vadd.xlane.f32.xlu1 %v2192_v57 }
 0x286   :  { %1065 = vadd.xlane.f32.xlu0 %v2196_v47 }
 0x288   :  { %1095 = vadd.xlane.f32.xlu1 %v2199_v10 }
 0x28a   :  { %1093 = vadd.xlane.f32.xlu0 %v2202_v4 }
 0x28b   :  { %v977_v52 = vpop.xlane.xlu1 %976 }
 0x28c   :  { %v1008_v60 = vsub.f32 %v2124_v40, %v977_v52  ;;  %1071 = vadd.xlane.f32.xlu1 %v2205_v44  ;;  %v2217_v40 = vpop.eup %1381 }
 0x28d   :  { %v979_v37 = vpop.xlane.xlu0 %978 }
 0x28e   :  { %v1051_v25 = vmul.f32 1.442695, %v1008_v60  ;;  %v1009_v26 = vsub.f32 %v2127_v54, %v979_v37  ;;  %1069 = vadd.xlane.f32.xlu0 %v2209_v28  ;;  %v2221_v54 = vpop.eup %1383 }
 0x28f   :  { %v953_v17 = vpop.xlane.xlu1 %952  ;;  %v2224_v14 = vpop.eup %1385 }
 0x290   :  { %1387 = vpow2.f32 %v1051_v25  ;;  %v1053_v55 = vmul.f32 1.442695, %v1009_v26  ;;  %v996_v31 = vsub.f32 %v2131_v18, %v953_v17  ;;  %1099 = vadd.xlane.f32.xlu1 %v2213_v58 }
 0x291   :  { %v955_v24 = vpop.xlane.xlu0 %954 }
 0x292   :  { %1389 = vpow2.f32 %v1053_v55  ;;  %v1027_v6 = vmul.f32 1.442695, %v996_v31  ;;  %v997_v16 = vsub.f32 %v2135_v8, %v955_v24  ;;  %1097 = vadd.xlane.f32.xlu0 %v2217_v40 }
 0x294   :  { %1391 = vpow2.f32 %v1027_v6  ;;  %v1029_v23 = vmul.f32 1.442695, %v997_v16  ;;  %1075 = vadd.xlane.f32.xlu1 %v2221_v54 }
 0x296   :  { %1393 = vpow2.f32 %v1029_v23  ;;  %1073 = vadd.xlane.f32.xlu0 %v2224_v14 }
 0x29a   :  { %v2227_v18 = vpop.eup %1387 }
 0x29b   :  { %1101 = vadd.xlane.f32.xlu0 %v2227_v18 }
 0x29c   :  { %v2230_v61 = vpop.eup %1389 }
 0x29d   :  { %1103 = vadd.xlane.f32.xlu1 %v2230_v61 }
 0x29e   :  { %v2233_v8 = vpop.eup %1391 }
 0x29f   :  { %1077 = vadd.xlane.f32.xlu0 %v2233_v8 }
 0x2a0   :  { %v2236_v7 = vpop.eup %1393 }
 0x2a1   :  { %1079 = vadd.xlane.f32.xlu1 %v2236_v7 }
 0x2b9   :  { %v981_v21 = vpop.xlane.xlu1 %980 }
 0x2ba   :  { %v1010_v27 = vsub.f32 %v2140_v12, %v981_v21 }
 0x2bb   :  { %v983_v20 = vpop.xlane.xlu0 %982 }
 0x2bc   :  { %v1055_v2 = vmul.f32 1.442695, %v1010_v27  ;;  %v1011_v15 = vsub.f32 %v2143_v32, %v983_v20 }
 0x2bd   :  { %v957_v39 = vpop.xlane.xlu1 %956 }
 0x2be   :  { %1395 = vpow2.f32 %v1055_v2  ;;  %v1057_v34 = vmul.f32 1.442695, %v1011_v15  ;;  %v998_v42 = vsub.f32 %v2147_v19, %v957_v39 }
 0x2bf   :  { %v959_v43 = vpop.xlane.xlu0 %958 }
 0x2c0   :  { %1397 = vpow2.f32 %v1057_v34  ;;  %v1031_v63 = vmul.f32 1.442695, %v998_v42  ;;  %v999_v45 = vsub.f32 %v2151_v0, %v959_v43 }
 0x2c2   :  { %1399 = vpow2.f32 %v1031_v63  ;;  %v1033_v46 = vmul.f32 1.442695, %v999_v45 }
 0x2c4   :  { %1401 = vpow2.f32 %v1033_v46 }
 0x2c8   :  { %v2243_v3 = vpop.eup %1395 }
 0x2c9   :  { %1105 = vadd.xlane.f32.xlu0 %v2243_v3 }
 0x2ca   :  { %v2246_v12 = vpop.eup %1397 }
 0x2cb   :  { %1107 = vadd.xlane.f32.xlu1 %v2246_v12 }
 0x2cc   :  { %v2249_v32 = vpop.eup %1399 }
 0x2cd   :  { %1081 = vadd.xlane.f32.xlu0 %v2249_v32 }
 0x2ce   :  { %v2252_v19 = vpop.eup %1401 }
 0x2cf   :  { %1083 = vadd.xlane.f32.xlu1 %v2252_v19 }
 0x2e1   :  { %v963_v0 = vpop.xlane.xlu0 %962 }
 0x2e2   :  { %v1001_v50 = vsub.f32 %v2156_v30, %v963_v0 }
 0x2e4   :  { %v1037_v33 = vmul.f32 1.442695, %v1001_v50 }
 0x2e6   :  { %1403 = vpow2.f32 %v1037_v33 }
 0x2e7   :  { %v985_v51 = vpop.xlane.xlu1 %984 }
 0x2e8   :  { %v1012_v59 = vsub.f32 %v2160_v9, %v985_v51 }
 0x2ea   :  { %v1059_v41 = vmul.f32 1.442695, %v1012_v59 }
 0x2eb   :  { %v961_v49 = vpop.xlane.xlu1 %960 }
 0x2ec   :  { %1405 = vpow2.f32 %v1059_v41  ;;  %v1000_v48 = vsub.f32 %v2164_v22, %v961_v49 }
 0x2ee   :  { %v1035_v53 = vmul.f32 1.442695, %v1000_v48 }
 0x2f0   :  { %v2258_v38 = vpop.eup %1403  ;;  %1407 = vpow2.f32 %v1035_v53 }
 0x2f1   :  { %1087 = vadd.xlane.f32.xlu1 %v2258_v38 }
 0x2f6   :  { %v2261_v1 = vpop.eup %1405 }
 0x2f7   :  { %1109 = vadd.xlane.f32.xlu0 %v2261_v1 }
 0x2fa   :  { %v2264_v30 = vpop.eup %1407 }
 0x2fb   :  { %1085 = vadd.xlane.f32.xlu0 %v2264_v30 }
 0x309   :  { %v965_v9 = vpop.xlane.xlu1 %964 }
 0x30a   :  { %v1002_v35 = vsub.f32 %v2173_v36, %v965_v9 }
 0x30b   :  { %v967_v13 = vpop.xlane.xlu0 %966 }
 0x30c   :  { %v1039_v56 = vmul.f32 1.442695, %v1002_v35  ;;  %v1003_v22 = vsub.f32 %v2177_v29, %v967_v13 }
 0x30d   :  { %v989_v11 = vpop.xlane.xlu1 %988 }
 0x30e   :  { %1409 = vpow2.f32 %v1039_v56  ;;  %v1041_v52 = vmul.f32 1.442695, %v1003_v22  ;;  %v1014_v60 = vsub.f32 %v2182_v5, %v989_v11 }
 0x30f   :  { %v987_v37 = vpop.xlane.xlu0 %986 }
 0x310   :  { %1411 = vpow2.f32 %v1041_v52  ;;  %v1063_v25 = vmul.f32 1.442695, %v1014_v60  ;;  %v1013_v26 = vsub.f32 %v2187_v62, %v987_v37 }
 0x311   :  { %v1068_v17 = vpop.xlane.xlu1 %1067 }
 0x312   :  { %1413 = vpow2.f32 %v1063_v25  ;;  %v1061_v55 = vmul.f32 1.442695, %v1013_v26 }
 0x313   :  { %1415 = vrcp.f32 %v1068_v17  ;;  %v1066_v31 = vpop.xlane.xlu0 %1065 }
 0x314   :  { %1417 = vpow2.f32 %v1061_v55 }
 0x315   :  { %1419 = vrcp.f32 %v1066_v31  ;;  %v1096_v36 = vpop.xlane.xlu1 %1095 }
 0x316   :  { %1421 = vrcp.f32 %v1096_v36 }
 0x317   :  { %v1094_v29 = vpop.xlane.xlu0 %1093 }
 0x318   :  { %v2271_v24 = vpop.eup %1409  ;;  %1423 = vrcp.f32 %v1094_v29 }
 0x319   :  { %1089 = vadd.xlane.f32.xlu0 %v2271_v24  ;;  %v1072_v5 = vpop.xlane.xlu1 %1071 }
 0x31a   :  { %v2274_v6 = vpop.eup %1411  ;;  %1425 = vrcp.f32 %v1072_v5 }
 0x31b   :  { %v1070_v62 = vpop.xlane.xlu0 %1069  ;;  %1091 = vadd.xlane.f32.xlu1 %v2274_v6 }
 0x31c   :  { %v2277_v16 = vpop.eup %1413  ;;  %1427 = vrcp.f32 %v1070_v62 }
 0x31d   :  { %v1416_v23 = vpop.eup %1415  ;;  %1113 = vadd.xlane.f32.xlu0 %v2277_v16  ;;  %v1100_v21 = vpop.xlane.xlu1 %1099 }
 0x31e   :  { %v2280_v27 = vpop.eup %1417  ;;  %v1118_v20 = vmul.f32 %v1416_v23, %v2192_v57  ;;  %1429 = vrcp.f32 %v1100_v21 }
 0x31f   :  { %v1420_v2 = vpop.eup %1419  ;;  %1111 = vadd.xlane.f32.xlu1 %v2280_v27  ;;  %v1098_v15 = vpop.xlane.xlu0 %1097 }
 0x320   :  { %v1422_v39 = vpop.eup %1421  ;;  %1166 = vst [vmem:[%s2388_s5 + $0x8] sm:$0xff] %v1118_v20  ;;  %v1116_v34 = vmul.f32 %v1420_v2, %v2196_v47  ;;  %1431 = vrcp.f32 %v1098_v15 }
 0x321   :  { %v1146_v42 = vmul.f32 %v1422_v39, %v2199_v10  ;;  %v1076_v43 = vpop.xlane.xlu1 %1075 }
 0x322   :  { %v1424_v63 = vpop.eup %1423  ;;  %1165 = vst [vmem:[%s2388_s5] sm:$0xff] %v1116_v34  ;;  %1433 = vrcp.f32 %v1076_v43 }
 0x323   :  { %1180 = vst [vmem:[%s2388_s5 + $0x78] sm:$0xff] %v1146_v42  ;;  %v1144_v57 = vmul.f32 %v1424_v63, %v2202_v4  ;;  %v1074_v45 = vpop.xlane.xlu0 %1073 }
 0x324   :  { %v1426_v46 = vpop.eup %1425  ;;  %1435 = vrcp.f32 %v1074_v45 }
 0x325   :  { %1179 = vst [vmem:[%s2388_s5 + $0x70] sm:$0xff] %v1144_v57  ;;  %v1122_v47 = vmul.f32 %v1426_v46, %v2205_v44 }
 0x326   :  { %v1428_v10 = vpop.eup %1427 }
 0x327   :  { %1168 = vst [vmem:[%s2388_s5 + $0x18] sm:$0xff] %v1122_v47  ;;  %v1120_v0 = vmul.f32 %v1428_v10, %v2209_v28 }
 0x328   :  { %v1430_v50 = vpop.eup %1429  ;;  %v1102_v33 = vpop.xlane.xlu0 %1101 }
 0x329   :  { %1167 = vst [vmem:[%s2388_s5 + $0x10] sm:$0xff] %v1120_v0  ;;  %v1150_v4 = vmul.f32 %v1430_v50, %v2213_v58  ;;  %1437 = vrcp.f32 %v1102_v33 }
 0x32a   :  { %v1432_v51 = vpop.eup %1431  ;;  %v1104_v59 = vpop.xlane.xlu1 %1103 }
 0x32b   :  { %1182 = vst [vmem:[%s2388_s5 + $0x88] sm:$0xff] %v1150_v4  ;;  %v1148_v44 = vmul.f32 %v1432_v51, %v2217_v40  ;;  %1439 = vrcp.f32 %v1104_v59 }
 0x32c   :  { %v1434_v41 = vpop.eup %1433  ;;  %v1078_v28 = vpop.xlane.xlu0 %1077 }
 0x32d   :  { %1181 = vst [vmem:[%s2388_s5 + $0x80] sm:$0xff] %v1148_v44  ;;  %v1126_v49 = vmul.f32 %v1434_v41, %v2221_v54  ;;  %1441 = vrcp.f32 %v1078_v28 }
 0x32e   :  { %v1436_v58 = vpop.eup %1435  ;;  %v1080_v48 = vpop.xlane.xlu1 %1079 }
 0x32f   :  { %1170 = vst [vmem:[%s2388_s5 + $0x28] sm:$0xff] %v1126_v49  ;;  %v1124_v53 = vmul.f32 %v1436_v58, %v2224_v14  ;;  %1443 = vrcp.f32 %v1080_v48 }
 0x331   :  { %1169 = vst [vmem:[%s2388_s5 + $0x20] sm:$0xff] %v1124_v53 }
 0x333   :  { %v1438_v40 = vpop.eup %1437 }
 0x334   :  { %v1152_v9 = vmul.f32 %v1438_v40, %v2227_v18 }
 0x335   :  { %v1440_v35 = vpop.eup %1439 }
 0x336   :  { %1183 = vst [vmem:[%s2388_s5 + $0x90] sm:$0xff] %v1152_v9  ;;  %v1154_v54 = vmul.f32 %v1440_v35, %v2230_v61 }
 0x337   :  { %v1442_v13 = vpop.eup %1441 }
 0x338   :  { %1184 = vst [vmem:[%s2388_s5 + $0x98] sm:$0xff] %v1154_v54  ;;  %v1128_v14 = vmul.f32 %v1442_v13, %v2233_v8 }
 0x339   :  { %v1444_v56 = vpop.eup %1443 }
 0x33a   :  { %1171 = vst [vmem:[%s2388_s5 + $0x30] sm:$0xff] %v1128_v14  ;;  %v1130_v18 = vmul.f32 %v1444_v56, %v2236_v7 }
 0x33c   :  { %1172 = vst [vmem:[%s2388_s5 + $0x38] sm:$0xff] %v1130_v18 }
 0x356   :  { %v1106_v22 = vpop.xlane.xlu0 %1105 }
 0x357   :  { %1445 = vrcp.f32 %v1106_v22 }
 0x358   :  { %v1108_v61 = vpop.xlane.xlu1 %1107 }
 0x359   :  { %1447 = vrcp.f32 %v1108_v61 }
 0x35a   :  { %v1082_v11 = vpop.xlane.xlu0 %1081 }
 0x35b   :  { %1449 = vrcp.f32 %v1082_v11 }
 0x35c   :  { %v1084_v52 = vpop.xlane.xlu1 %1083 }
 0x35d   :  { %1451 = vrcp.f32 %v1084_v52 }
 0x361   :  { %v1446_v8 = vpop.eup %1445 }
 0x362   :  { %v1156_v60 = vmul.f32 %v1446_v8, %v2243_v3 }
 0x363   :  { %v1448_v37 = vpop.eup %1447 }
 0x364   :  { %1185 = vst [vmem:[%s2388_s5 + $0xa0] sm:$0xff] %v1156_v60  ;;  %v1158_v7 = vmul.f32 %v1448_v37, %v2246_v12 }
 0x365   :  { %v1450_v25 = vpop.eup %1449 }
 0x366   :  { %1186 = vst [vmem:[%s2388_s5 + $0xa8] sm:$0xff] %v1158_v7  ;;  %v1132_v26 = vmul.f32 %v1450_v25, %v2249_v32 }
 0x367   :  { %v1452_v17 = vpop.eup %1451 }
 0x368   :  { %1173 = vst [vmem:[%s2388_s5 + $0x40] sm:$0xff] %v1132_v26  ;;  %v1134_v3 = vmul.f32 %v1452_v17, %v2252_v19 }
 0x36a   :  { %1174 = vst [vmem:[%s2388_s5 + $0x48] sm:$0xff] %v1134_v3 }
 0x37e   :  { %v1088_v55 = vpop.xlane.xlu1 %1087 }
 0x37f   :  { %1453 = vrcp.f32 %v1088_v55 }
 0x384   :  { %v1110_v12 = vpop.xlane.xlu0 %1109 }
 0x385   :  { %1455 = vrcp.f32 %v1110_v12 }
 0x388   :  { %v1086_v31 = vpop.xlane.xlu0 %1085 }
 0x389   :  { %v1454_v36 = vpop.eup %1453  ;;  %1457 = vrcp.f32 %v1086_v31 }
 0x38a   :  { %v1138_v32 = vmul.f32 %v1454_v36, %v2258_v38 }
 0x38c   :  { %1176 = vst [vmem:[%s2388_s5 + $0x58] sm:$0xff] %v1138_v32 }
 0x38f   :  { %v1456_v29 = vpop.eup %1455 }
 0x390   :  { %v1160_v19 = vmul.f32 %v1456_v29, %v2261_v1 }
 0x392   :  { %1187 = vst [vmem:[%s2388_s5 + $0xb0] sm:$0xff] %v1160_v19 }
 0x393   :  { %v1458_v5 = vpop.eup %1457 }
 0x394   :  { %v1136_v62 = vmul.f32 %v1458_v5, %v2264_v30 }
 0x396   :  { %1175 = vst [vmem:[%s2388_s5 + $0x50] sm:$0xff] %v1136_v62 }
 0x3a6   :  { %v1090_v23 = vpop.xlane.xlu0 %1089 }
 0x3a7   :  { %1459 = vrcp.f32 %v1090_v23 }
 0x3a8   :  { %v1092_v38 = vpop.xlane.xlu1 %1091 }
 0x3a9   :  { %1461 = vrcp.f32 %v1092_v38 }
 0x3aa   :  { %v1114_v21 = vpop.xlane.xlu0 %1113 }
 0x3ab   :  { %1463 = vrcp.f32 %v1114_v21 }
 0x3ac   :  { %v1112_v20 = vpop.xlane.xlu1 %1111 }
 0x3ad   :  { %1465 = vrcp.f32 %v1112_v20 }
 0x3b1   :  { %v1460_v1 = vpop.eup %1459 }
 0x3b2   :  { %v1140_v2 = vmul.f32 %v1460_v1, %v2271_v24 }
 0x3b3   :  { %v1462_v15 = vpop.eup %1461 }
 0x3b4   :  { %1177 = vst [vmem:[%s2388_s5 + $0x60] sm:$0xff] %v1140_v2  ;;  %v1142_v30 = vmul.f32 %v1462_v15, %v2274_v6 }
 0x3b5   :  { %v1464_v39 = vpop.eup %1463 }
 0x3b6   :  { %1178 = vst [vmem:[%s2388_s5 + $0x68] sm:$0xff] %v1142_v30  ;;  %v1164_v34 = vmul.f32 %v1464_v39, %v2277_v16 }
 0x3b7   :  { %v1466_v42 = vpop.eup %1465 }
 0x3b8   :  { %1189 = vst [vmem:[%s2388_s5 + $0xc0] sm:$0xff] %v1164_v34  ;;  %v1162_v24 = vmul.f32 %v1466_v42, %v2280_v27 }
 0x3ba   :  { %1188 = vst [vmem:[%s2388_s5 + $0xb8] sm:$0xff] %v1162_v24 }

</bundles_post_ra>
